<compile_context>
chip_gen: v7x
topology: tpu7x:2x2x1
jax: 0.10.0
libtpu: 0.0.40
codegen_flags: <defaults>
</compile_context>

<pallas_src>
import functools

import numpy as np
import jax
import jax.numpy as jnp
from jax.experimental import pallas as pl
from jax.experimental.pallas import tpu as pltpu


def _round_up(n, m):
    return ((n + m - 1) // m) * m


def _rtm_kernel(q_ref, ds_ref, tdamp_ref, ddamp_ref, dsrc_ref,
                rxsel_ref, rzsel_ref,
                d_ref, pfin_ref,
                p_a, p_b,
                *, nt, k, hw, w):
    """Full nt-step propagation.

    q_ref      (nt,)           SMEM  source wavelet (one scalar per step)
    ds_ref     (nxp, nzp)      VMEM  damp * dt^2 / m
    tdamp_ref  (nxp, nzp)      VMEM  2 * damp
    ddamp_ref  (nxp, nzp)      VMEM  damp * damp
    dsrc_ref   (nxp, nzp)      VMEM  damp * one_hot(sx, sz)
    rxsel_ref  (nxp, nrec_pad) VMEM  one-hot receiver rows
    rzsel_ref  (nzp, nrec_pad) VMEM  one-hot receiver cols
    d_ref      (nt, nrec_pad)  VMEM  output trace
    pfin_ref   (nxp, nzp)      VMEM  output final wavefield
    p_a, p_b   (nxp, nzp)      VMEM  ping-pong wavefield scratch
    """
    nxp, nzp = p_a.shape

    p_a[...] = jnp.zeros_like(p_a)
    p_b[...] = jnp.zeros_like(p_b)

    def step(j, cur_ref, new_ref):
        # cur_ref holds p_curr; new_ref holds p_prev and receives p_new.
        pc = cur_ref[...]

        # 5x5 zero-padded cross-correlation (== PyTorch Conv2d, padding=hw):
        #   lap[i,j] = sum_{a,b} w[a,b] * P[i+a-hw, j+b-hw]
        # (k-1) lane rolls of pc (reused across a) + (k-1) sublane rolls of
        # the weight-folded z-combinations.  Halo rows/cols are exactly zero,
        # so roll wrap-around implements the zero padding at interior points.
        pz = []
        for b in range(k):
            s = (hw - b) % nzp
            pz.append(pc if s == 0 else pltpu.roll(pc, shift=s, axis=1))
        lap = None
        for a in range(k):
            zc = None
            for b in range(k):
                term = float(w[a, b]) * pz[b]
                zc = term if zc is None else zc + term
            s = (hw - a) % nxp
            xs = zc if s == 0 else pltpu.roll(zc, shift=s, axis=0)
            lap = xs if lap is None else lap + xs

        qj = q_ref[j]
        pp = new_ref[...]
        # p_new = damp*(scale*lap + 2*pc - damp*pp + q_src) with the
        # loop-invariant damp products folded in the wrapper.
        p_new = (ds_ref[...] * lap + tdamp_ref[...] * pc
                 - ddamp_ref[...] * pp + qj * dsrc_ref[...])
        new_ref[...] = p_new

        # receiver sampling: d[j, r] = p_new[xrec[r], zrec[r]]
        sel = jnp.dot(p_new, rzsel_ref[...],
                      preferred_element_type=jnp.float32)        # (nxp, nrec)
        rec = jnp.sum(rxsel_ref[...] * sel, axis=0, keepdims=True)
        d_ref[pl.ds(j, 1), :] = rec                               # lane-dense

    # time loop, unrolled by 2 so the ping-pong buffers swap roles statically
    @pl.loop(0, nt // 2)
    def _pair(i):
        j = 2 * i
        step(j, p_a, p_b)
        step(j + 1, p_b, p_a)

    if nt % 2 == 1:
        step(nt - 1, p_a, p_b)
        pfin_ref[...] = p_b[...]
    else:
        pfin_ref[...] = p_a[...]


def absorbing_boundaries(nx, nz, width=10, alpha=0.05):
    # TODO(synk): absorbing_boundaries() is not defined in the reference
    # script; using a deterministic quadratic damping taper near the edges.
    def profile(n):
        i = np.arange(n, dtype=np.float32)
        d = np.minimum(i, (n - 1) - i)
        t = np.clip(d / float(width), 0.0, 1.0)
        return 1.0 - alpha * (1.0 - t) ** 2
    return (profile(nx)[:, None] * profile(nz)[None, :]).astype(np.float32)


def ricker_wavelet(nt, dt, f0):
    t = np.arange(nt, dtype=np.float32) * dt
    t0 = 1.0 / f0
    arg = (np.pi * f0 * (t - t0)) ** 2
    return jnp.asarray(((1.0 - 2.0 * arg) * np.exp(-arg)).astype(np.float32))


class PallasNet:
    """Pallas-TPU equivalent of the PyTorch `Net` forward pass."""

    def __init__(self, nx, nz, dt, nt, m, xrec, zrec, order=4, key=None):
        self.nx, self.nz, self.dt, self.nt = nx, nz, float(dt), nt
        self.order = order
        k = order + 1
        hw = order // 2

        # Conv2d(1, 1, (k, k), bias=False) weight, deterministic init matching
        # PyTorch's default U(-1/sqrt(fan_in), 1/sqrt(fan_in)) bound.
        key = jax.random.PRNGKey(0) if key is None else key
        bound = 1.0 / np.sqrt(k * k)
        self.weight = jax.random.uniform(key, (k, k), jnp.float32,
                                         minval=-bound, maxval=bound)
        w_np = np.asarray(self.weight, np.float32)

        self.m = np.asarray(m, np.float32)
        self.scale = (self.dt ** 2) / self.m            # (nx, nz) unpadded
        self.damp = absorbing_boundaries(nx, nz)        # (nx, nz) unpadded

        self.xrec = np.asarray(xrec, np.int64)
        self.zrec = np.asarray(zrec, np.int64)
        self.nrec = len(self.xrec)
        nrec = self.nrec

        # --- padded geometry: >= hw zero halo on every side; nz (lanes) and
        # nrec padded to multiples of 128, nx (sublanes) to a multiple of 8.
        self.xoff = hw
        self.zoff = hw
        self.nxp = _round_up(nx + 2 * hw, 8)
        self.nzp = _round_up(nz + 2 * hw, 128)
        self.nrec_pad = _round_up(max(nrec, 1), 128)
        nxp, nzp, nrp = self.nxp, self.nzp, self.nrec_pad

        damp_p = np.zeros((nxp, nzp), np.float32)
        damp_p[hw:hw + nx, hw:hw + nz] = self.damp
        scale_p = np.zeros((nxp, nzp), np.float32)
        scale_p[hw:hw + nx, hw:hw + nz] = self.scale

        # loop-invariant VPU products hoisted out of the time loop
        self.damp_scale = jnp.asarray(damp_p * scale_p)    # damp * dt^2/m
        self.two_damp = jnp.asarray(2.0 * damp_p)
        self.damp_sq = jnp.asarray(damp_p * damp_p)
        self._damp_p = jnp.asarray(damp_p)

        rxsel = np.zeros((nxp, nrp), np.float32)
        rxsel[self.xrec + hw, np.arange(nrec)] = 1.0
        rzsel = np.zeros((nzp, nrp), np.float32)
        rzsel[self.zrec + hw, np.arange(nrec)] = 1.0
        self.rxsel = jnp.asarray(rxsel)
        self.rzsel = jnp.asarray(rzsel)

        kernel = functools.partial(_rtm_kernel, nt=nt, k=k, hw=hw, w=w_np)
        vmem = pl.BlockSpec(memory_space=pltpu.MemorySpace.VMEM)
        smem = pl.BlockSpec(memory_space=pltpu.MemorySpace.SMEM)
        self._call = pl.pallas_call(
            kernel,
            out_shape=(jax.ShapeDtypeStruct((nt, nrp), jnp.float32),   # d
                       jax.ShapeDtypeStruct((nxp, nzp), jnp.float32)), # p_fin
            in_specs=[smem,   # q (scalars, one read per time step)
                      vmem,   # damp * dt^2/m
                      vmem,   # 2*damp
                      vmem,   # damp^2
                      vmem,   # damp * src one-hot
                      vmem,   # rxsel
                      vmem],  # rzsel
            out_specs=(vmem, vmem),
            scratch_shapes=[pltpu.VMEM((nxp, nzp), jnp.float32),   # ping
                            pltpu.VMEM((nxp, nzp), jnp.float32)],  # pong
        )

    def __call__(self, q, sx, sz):
        src = jnp.zeros((self.nxp, self.nzp), jnp.float32)
        src = src.at[sx + self.xoff, sz + self.zoff].set(1.0)
        dsrc = self._damp_p * src
        d_pred, p_fin = self._call(jnp.asarray(q, jnp.float32),
                                   self.damp_scale, self.two_damp,
                                   self.damp_sq, dsrc,
                                   self.rxsel, self.rzsel)
        # crop padding, restore PyTorch shapes (1,1,nt,nrec) and (1,1,nx,nz)
        d_pred = d_pred[:, :self.nrec]
        p_fin = p_fin[self.xoff:self.xoff + self.nx,
                      self.zoff:self.zoff + self.nz]
        return d_pred[None, None], p_fin[None, None]


def reference_forward(net, q, sx, sz):
    """Pure NumPy (float64) oracle of the PyTorch forward pass."""
    nx, nz, nt = net.nx, net.nz, net.nt
    k, hw = net.order + 1, net.order // 2
    scale = np.asarray(net.scale, np.float64)
    damp = np.asarray(net.damp, np.float64)
    w = np.asarray(net.weight, np.float64)
    qn = np.asarray(q, np.float64)

    def lap(p):
        padp = np.zeros((nx + 2 * hw, nz + 2 * hw))
        padp[hw:hw + nx, hw:hw + nz] = p
        out = np.zeros((nx, nz))
        for a in range(k):
            for b in range(k):
                out += w[a, b] * padp[a:a + nx, b:b + nz]
        return out

    p_prev = np.zeros((nx, nz))
    p_curr = np.zeros((nx, nz))
    d = np.zeros((nt, net.nrec))
    for j in range(nt):
        qc = np.zeros((nx, nz))
        qc[sx, sz] = qn[j]
        p_new = damp * (scale * lap(p_curr) + 2.0 * p_curr - damp * p_prev + qc)
        p_prev, p_curr = p_curr, p_new
        d[j] = p_curr[net.xrec, net.zrec]
    return d, p_curr


if __name__ == "__main__":
    # Small shapes consistent with the module's forward pass.
    nx, nz = 32, 32
    nt = 16
    dt = 0.001
    order = 4
    f0 = 15.0

    v0 = jnp.ones((nx, nz), jnp.float32) * 1500.0
    m0 = (1.0 / v0) ** 2
    xrec = np.arange(4, 12)                 # nrec = 8 receivers
    zrec = np.ones(len(xrec), np.int64) * 8
    sx, sz = 16, 8

    net = PallasNet(nx, nz, dt, nt, m0, xrec, zrec, order=order,
                    key=jax.random.PRNGKey(0))
    q = ricker_wavelet(nt, dt, f0)

    d_pred, p_final = net(q, sx, sz)
    jax.block_until_ready((d_pred, p_final))

    d_ref, p_ref = reference_forward(net, q, sx, sz)
    np.testing.assert_allclose(np.asarray(d_pred)[0, 0], d_ref,
                               rtol=2e-2, atol=1e-8)
    np.testing.assert_allclose(np.asarray(p_final)[0, 0], p_ref,
                               rtol=2e-2, atol=1e-8)
    print("KERNEL_OK")
</pallas_src>

<mosaic_0001>
module attributes {stable_mosaic.version = 11 : i64} {
  func.func @_rtm_kernel(%arg0: memref<16xf32, #tpu.memory_space<smem>>, %arg1: memref<40x128xf32, #tpu.memory_space<vmem>>, %arg2: memref<40x128xf32, #tpu.memory_space<vmem>>, %arg3: memref<40x128xf32, #tpu.memory_space<vmem>>, %arg4: memref<40x128xf32, #tpu.memory_space<vmem>>, %arg5: memref<40x128xf32, #tpu.memory_space<vmem>>, %arg6: memref<128x128xf32, #tpu.memory_space<vmem>>, %arg7: memref<16x128xf32, #tpu.memory_space<vmem>>, %arg8: memref<40x128xf32, #tpu.memory_space<vmem>>, %arg9: memref<40x128xf32, #tpu.memory_space<vmem>>, %arg10: memref<40x128xf32, #tpu.memory_space<vmem>>) attributes {dimension_semantics = [], scalar_prefetch = 0 : i64, scratch_operands = 2 : i64, tpu.core_type = #tpu.core_type<tc>} {
    %cst = arith.constant 0.000000e+00 : f32
    %0 = vector.broadcast %cst : f32 to vector<40x128xf32>
    %c0 = arith.constant 0 : index
    %c0_0 = arith.constant 0 : index
    %1 = vector.load %arg9[%c0, %c0_0] : memref<40x128xf32, #tpu.memory_space<vmem>>, vector<40x128xf32>
    tpu.vector_store %arg9[%c0, %c0_0], %0 {strides = array<i32>} : memref<40x128xf32, #tpu.memory_space<vmem>>, vector<40x128xf32>,
    %cst_1 = arith.constant 0.000000e+00 : f32
    %2 = vector.broadcast %cst_1 : f32 to vector<40x128xf32>
    %c0_2 = arith.constant 0 : index
    %c0_3 = arith.constant 0 : index
    %3 = vector.load %arg10[%c0_2, %c0_3] : memref<40x128xf32, #tpu.memory_space<vmem>>, vector<40x128xf32>
    tpu.vector_store %arg10[%c0_2, %c0_3], %2 {strides = array<i32>} : memref<40x128xf32, #tpu.memory_space<vmem>>, vector<40x128xf32>,
    %c0_i32 = arith.constant 0 : i32
    %c8_i32 = arith.constant 8 : i32
    %4 = arith.addi %c0_i32, %c8_i32 : i32
    %c1_i32 = arith.constant 1 : i32
    scf.for %arg11 = %c0_i32 to %4 step %c1_i32  : i32 {
      %c1_i32_9 = arith.constant 1 : i32
      %7 = arith.muli %arg11, %c1_i32_9 : i32
      %c0_i32_10 = arith.constant 0 : i32
      %8 = arith.addi %c0_i32_10, %7 : i32
      %c2_i32 = arith.constant 2 : i32
      %9 = arith.muli %c2_i32, %8 : i32
      %c0_11 = arith.constant 0 : index
      %c0_12 = arith.constant 0 : index
      %10 = vector.load %arg9[%c0_11, %c0_12] : memref<40x128xf32, #tpu.memory_space<vmem>>, vector<40x128xf32>
      %c2_i32_13 = arith.constant 2 : i32
      %11 = tpu.dynamic_rotate %10 by %c2_i32_13 dim 1 : vector<40x128xf32>, i32 -> vector<40x128xf32>
      %c1_i32_14 = arith.constant 1 : i32
      %12 = tpu.dynamic_rotate %10 by %c1_i32_14 dim 1 : vector<40x128xf32>, i32 -> vector<40x128xf32>
      %c127_i32 = arith.constant 127 : i32
      %13 = tpu.dynamic_rotate %10 by %c127_i32 dim 1 : vector<40x128xf32>, i32 -> vector<40x128xf32>
      %c126_i32 = arith.constant 126 : i32
      %14 = tpu.dynamic_rotate %10 by %c126_i32 dim 1 : vector<40x128xf32>, i32 -> vector<40x128xf32>
      %cst_15 = arith.constant 0.179066807 : f32
      %15 = vector.broadcast %cst_15 : f32 to vector<40x128xf32>
      %16 = arith.mulf %15, %11 : vector<40x128xf32>
      %cst_16 = arith.constant 0.191431955 : f32
      %17 = vector.broadcast %cst_16 : f32 to vector<40x128xf32>
      %18 = arith.mulf %17, %12 : vector<40x128xf32>
      %19 = arith.addf %16, %18 : vector<40x128xf32>
      %cst_17 = arith.constant -0.0670834109 : f32
      %20 = vector.broadcast %cst_17 : f32 to vector<40x128xf32>
      %21 = arith.mulf %20, %10 : vector<40x128xf32>
      %22 = arith.addf %19, %21 : vector<40x128xf32>
      %cst_18 = arith.constant -0.012532616 : f32
      %23 = vector.broadcast %cst_18 : f32 to vector<40x128xf32>
      %24 = arith.mulf %23, %13 : vector<40x128xf32>
      %25 = arith.addf %22, %24 : vector<40x128xf32>
      %cst_19 = arith.constant 0.0279554855 : f32
      %26 = vector.broadcast %cst_19 : f32 to vector<40x128xf32>
      %27 = arith.mulf %26, %14 : vector<40x128xf32>
      %28 = arith.addf %25, %27 : vector<40x128xf32>
      %c2_i32_20 = arith.constant 2 : i32
      %29 = tpu.dynamic_rotate %28 by %c2_i32_20 dim 0 : vector<40x128xf32>, i32 -> vector<40x128xf32>
      %cst_21 = arith.constant -0.133798793 : f32
      %30 = vector.broadcast %cst_21 : f32 to vector<40x128xf32>
      %31 = arith.mulf %30, %11 : vector<40x128xf32>
      %cst_22 = arith.constant -0.0759221539 : f32
      %32 = vector.broadcast %cst_22 : f32 to vector<40x128xf32>
      %33 = arith.mulf %32, %12 : vector<40x128xf32>
      %34 = arith.addf %31, %33 : vector<40x128xf32>
      %cst_23 = arith.constant 0.0757922158 : f32
      %35 = vector.broadcast %cst_23 : f32 to vector<40x128xf32>
      %36 = arith.mulf %35, %10 : vector<40x128xf32>
      %37 = arith.addf %34, %36 : vector<40x128xf32>
      %cst_24 = arith.constant 0.0987066254 : f32
      %38 = vector.broadcast %cst_24 : f32 to vector<40x128xf32>
      %39 = arith.mulf %38, %13 : vector<40x128xf32>
      %40 = arith.addf %37, %39 : vector<40x128xf32>
      %cst_25 = arith.constant -0.131594181 : f32
      %41 = vector.broadcast %cst_25 : f32 to vector<40x128xf32>
      %42 = arith.mulf %41, %14 : vector<40x128xf32>
      %43 = arith.addf %40, %42 : vector<40x128xf32>
      %c1_i32_26 = arith.constant 1 : i32
      %44 = tpu.dynamic_rotate %43 by %c1_i32_26 dim 0 : vector<40x128xf32>, i32 -> vector<40x128xf32>
      %45 = arith.addf %29, %44 : vector<40x128xf32>
      %cst_27 = arith.constant 0.194141537 : f32
      %46 = vector.broadcast %cst_27 : f32 to vector<40x128xf32>
      %47 = arith.mulf %46, %11 : vector<40x128xf32>
      %cst_28 = arith.constant -0.189886957 : f32
      %48 = vector.broadcast %cst_28 : f32 to vector<40x128xf32>
      %49 = arith.mulf %48, %12 : vector<40x128xf32>
      %50 = arith.addf %47, %49 : vector<40x128xf32>
      %cst_29 = arith.constant 0.056016732 : f32
      %51 = vector.broadcast %cst_29 : f32 to vector<40x128xf32>
      %52 = arith.mulf %51, %10 : vector<40x128xf32>
      %53 = arith.addf %50, %52 : vector<40x128xf32>
      %cst_30 = arith.constant 0.0250763427 : f32
      %54 = vector.broadcast %cst_30 : f32 to vector<40x128xf32>
      %55 = arith.mulf %54, %13 : vector<40x128xf32>
      %56 = arith.addf %53, %55 : vector<40x128xf32>
      %cst_31 = arith.constant 0.159685522 : f32
      %57 = vector.broadcast %cst_31 : f32 to vector<40x128xf32>
      %58 = arith.mulf %57, %14 : vector<40x128xf32>
      %59 = arith.addf %56, %58 : vector<40x128xf32>
      %60 = arith.addf %45, %59 : vector<40x128xf32>
      %cst_32 = arith.constant 0.173815012 : f32
      %61 = vector.broadcast %cst_32 : f32 to vector<40x128xf32>
      %62 = arith.mulf %61, %11 : vector<40x128xf32>
      %cst_33 = arith.constant 0.13365607 : f32
      %63 = vector.broadcast %cst_33 : f32 to vector<40x128xf32>
      %64 = arith.mulf %63, %12 : vector<40x128xf32>
      %65 = arith.addf %62, %64 : vector<40x128xf32>
      %cst_34 = arith.constant 0.0902464911 : f32
      %66 = vector.broadcast %cst_34 : f32 to vector<40x128xf32>
      %67 = arith.mulf %66, %10 : vector<40x128xf32>
      %68 = arith.addf %65, %67 : vector<40x128xf32>
      %cst_35 = arith.constant 3.941250e-03 : f32
      %69 = vector.broadcast %cst_35 : f32 to vector<40x128xf32>
      %70 = arith.mulf %69, %13 : vector<40x128xf32>
      %71 = arith.addf %68, %70 : vector<40x128xf32>
      %cst_36 = arith.constant -0.188939139 : f32
      %72 = vector.broadcast %cst_36 : f32 to vector<40x128xf32>
      %73 = arith.mulf %72, %14 : vector<40x128xf32>
      %74 = arith.addf %71, %73 : vector<40x128xf32>
      %c39_i32 = arith.constant 39 : i32
      %75 = tpu.dynamic_rotate %74 by %c39_i32 dim 0 : vector<40x128xf32>, i32 -> vector<40x128xf32>
      %76 = arith.addf %60, %75 : vector<40x128xf32>
      %cst_37 = arith.constant -0.187404498 : f32
      %77 = vector.broadcast %cst_37 : f32 to vector<40x128xf32>
      %78 = arith.mulf %77, %11 : vector<40x128xf32>
      %cst_38 = arith.constant 0.183207512 : f32
      %79 = vector.broadcast %cst_38 : f32 to vector<40x128xf32>
      %80 = arith.mulf %79, %12 : vector<40x128xf32>
      %81 = arith.addf %78, %80 : vector<40x128xf32>
      %cst_39 = arith.constant 0.00752768526 : f32
      %82 = vector.broadcast %cst_39 : f32 to vector<40x128xf32>
      %83 = arith.mulf %82, %10 : vector<40x128xf32>
      %84 = arith.addf %81, %83 : vector<40x128xf32>
      %cst_40 = arith.constant 0.116885662 : f32
      %85 = vector.broadcast %cst_40 : f32 to vector<40x128xf32>
      %86 = arith.mulf %85, %13 : vector<40x128xf32>
      %87 = arith.addf %84, %86 : vector<40x128xf32>
      %cst_41 = arith.constant 0.0208967682 : f32
      %88 = vector.broadcast %cst_41 : f32 to vector<40x128xf32>
      %89 = arith.mulf %88, %14 : vector<40x128xf32>
      %90 = arith.addf %87, %89 : vector<40x128xf32>
      %c38_i32 = arith.constant 38 : i32
      %91 = tpu.dynamic_rotate %90 by %c38_i32 dim 0 : vector<40x128xf32>, i32 -> vector<40x128xf32>
      %92 = arith.addf %76, %91 : vector<40x128xf32>
      %93 = arith.index_cast %9 : i32 to index
      %94 = memref.load %arg0[%93] : memref<16xf32, #tpu.memory_space<smem>>
      %c0_42 = arith.constant 0 : index
      %c0_43 = arith.constant 0 : index
      %95 = vector.load %arg10[%c0_42, %c0_43] : memref<40x128xf32, #tpu.memory_space<vmem>>, vector<40x128xf32>
      %c0_44 = arith.constant 0 : index
      %c0_45 = arith.constant 0 : index
      %96 = vector.load %arg1[%c0_44, %c0_45] : memref<40x128xf32, #tpu.memory_space<vmem>>, vector<40x128xf32>
      %97 = arith.mulf %96, %92 : vector<40x128xf32>
      %c0_46 = arith.constant 0 : index
      %c0_47 = arith.constant 0 : index
      %98 = vector.load %arg2[%c0_46, %c0_47] : memref<40x128xf32, #tpu.memory_space<vmem>>, vector<40x128xf32>
      %99 = arith.mulf %98, %10 : vector<40x128xf32>
      %100 = arith.addf %97, %99 : vector<40x128xf32>
      %c0_48 = arith.constant 0 : index
      %c0_49 = arith.constant 0 : index
      %101 = vector.load %arg3[%c0_48, %c0_49] : memref<40x128xf32, #tpu.memory_space<vmem>>, vector<40x128xf32>
      %102 = arith.mulf %101, %95 : vector<40x128xf32>
      %103 = arith.subf %100, %102 : vector<40x128xf32>
      %c0_50 = arith.constant 0 : index
      %c0_51 = arith.constant 0 : index
      %104 = vector.load %arg4[%c0_50, %c0_51] : memref<40x128xf32, #tpu.memory_space<vmem>>, vector<40x128xf32>
      %105 = vector.broadcast %94 : f32 to vector<40x128xf32>
      %106 = arith.mulf %105, %104 : vector<40x128xf32>
      %107 = arith.addf %103, %106 : vector<40x128xf32>
      %c0_52 = arith.constant 0 : index
      %c0_53 = arith.constant 0 : index
      %108 = vector.load %arg10[%c0_52, %c0_53] : memref<40x128xf32, #tpu.memory_space<vmem>>, vector<40x128xf32>
      tpu.vector_store %arg10[%c0_52, %c0_53], %107 {strides = array<i32>} : memref<40x128xf32, #tpu.memory_space<vmem>>, vector<40x128xf32>,
      %c0_54 = arith.constant 0 : index
      %c0_55 = arith.constant 0 : index
      %109 = vector.load %arg6[%c0_54, %c0_55] : memref<128x128xf32, #tpu.memory_space<vmem>>, vector<128x128xf32>
      %cst_56 = arith.constant dense<0.000000e+00> : vector<40x128xf32>
      %110 = tpu.matmul %107, %109, %cst_56 {dimension_numbers = #tpu.dot_dimension_numbers<[1], [0], [0], [1], [0, 0, 1, 1], [], []>} : vector<40x128xf32>, vector<128x128xf32>, vector<40x128xf32> -> vector<40x128xf32>
      %c0_57 = arith.constant 0 : index
      %c0_58 = arith.constant 0 : index
      %111 = vector.load %arg5[%c0_57, %c0_58] : memref<40x128xf32, #tpu.memory_space<vmem>>, vector<40x128xf32>
      %112 = arith.mulf %111, %110 : vector<40x128xf32>
      %cst_59 = arith.constant dense<0.000000e+00> : vector<128xf32>
      %113 = vector.multi_reduction <add>, %112, %cst_59 [0] : vector<40x128xf32> to vector<128xf32>
      %114 = vector.shape_cast %113 : vector<128xf32> to vector<1x128xf32>
      %115 = arith.index_cast %9 : i32 to index
      %c0_60 = arith.constant 0 : index
      %116 = vector.load %arg7[%115, %c0_60] : memref<16x128xf32, #tpu.memory_space<vmem>>, vector<1x128xf32>
      tpu.vector_store %arg7[%115, %c0_60], %114 {strides = array<i32>} : memref<16x128xf32, #tpu.memory_space<vmem>>, vector<1x128xf32>,
      %c1_i32_61 = arith.constant 1 : i32
      %117 = arith.addi %9, %c1_i32_61 : i32
      %c0_62 = arith.constant 0 : index
      %c0_63 = arith.constant 0 : index
      %118 = vector.load %arg10[%c0_62, %c0_63] : memref<40x128xf32, #tpu.memory_space<vmem>>, vector<40x128xf32>
      %c2_i32_64 = arith.constant 2 : i32
      %119 = tpu.dynamic_rotate %118 by %c2_i32_64 dim 1 : vector<40x128xf32>, i32 -> vector<40x128xf32>
      %c1_i32_65 = arith.constant 1 : i32
      %120 = tpu.dynamic_rotate %118 by %c1_i32_65 dim 1 : vector<40x128xf32>, i32 -> vector<40x128xf32>
      %c127_i32_66 = arith.constant 127 : i32
      %121 = tpu.dynamic_rotate %118 by %c127_i32_66 dim 1 : vector<40x128xf32>, i32 -> vector<40x128xf32>
      %c126_i32_67 = arith.constant 126 : i32
      %122 = tpu.dynamic_rotate %118 by %c126_i32_67 dim 1 : vector<40x128xf32>, i32 -> vector<40x128xf32>
      %cst_68 = arith.constant 0.179066807 : f32
      %123 = vector.broadcast %cst_68 : f32 to vector<40x128xf32>
      %124 = arith.mulf %123, %119 : vector<40x128xf32>
      %cst_69 = arith.constant 0.191431955 : f32
      %125 = vector.broadcast %cst_69 : f32 to vector<40x128xf32>
      %126 = arith.mulf %125, %120 : vector<40x128xf32>
      %127 = arith.addf %124, %126 : vector<40x128xf32>
      %cst_70 = arith.constant -0.0670834109 : f32
      %128 = vector.broadcast %cst_70 : f32 to vector<40x128xf32>
      %129 = arith.mulf %128, %118 : vector<40x128xf32>
      %130 = arith.addf %127, %129 : vector<40x128xf32>
      %cst_71 = arith.constant -0.012532616 : f32
      %131 = vector.broadcast %cst_71 : f32 to vector<40x128xf32>
      %132 = arith.mulf %131, %121 : vector<40x128xf32>
      %133 = arith.addf %130, %132 : vector<40x128xf32>
      %cst_72 = arith.constant 0.0279554855 : f32
      %134 = vector.broadcast %cst_72 : f32 to vector<40x128xf32>
      %135 = arith.mulf %134, %122 : vector<40x128xf32>
      %136 = arith.addf %133, %135 : vector<40x128xf32>
      %c2_i32_73 = arith.constant 2 : i32
      %137 = tpu.dynamic_rotate %136 by %c2_i32_73 dim 0 : vector<40x128xf32>, i32 -> vector<40x128xf32>
      %cst_74 = arith.constant -0.133798793 : f32
      %138 = vector.broadcast %cst_74 : f32 to vector<40x128xf32>
      %139 = arith.mulf %138, %119 : vector<40x128xf32>
      %cst_75 = arith.constant -0.0759221539 : f32
      %140 = vector.broadcast %cst_75 : f32 to vector<40x128xf32>
      %141 = arith.mulf %140, %120 : vector<40x128xf32>
      %142 = arith.addf %139, %141 : vector<40x128xf32>
      %cst_76 = arith.constant 0.0757922158 : f32
      %143 = vector.broadcast %cst_76 : f32 to vector<40x128xf32>
      %144 = arith.mulf %143, %118 : vector<40x128xf32>
      %145 = arith.addf %142, %144 : vector<40x128xf32>
      %cst_77 = arith.constant 0.0987066254 : f32
      %146 = vector.broadcast %cst_77 : f32 to vector<40x128xf32>
      %147 = arith.mulf %146, %121 : vector<40x128xf32>
      %148 = arith.addf %145, %147 : vector<40x128xf32>
      %cst_78 = arith.constant -0.131594181 : f32
      %149 = vector.broadcast %cst_78 : f32 to vector<40x128xf32>
      %150 = arith.mulf %149, %122 : vector<40x128xf32>
      %151 = arith.addf %148, %150 : vector<40x128xf32>
      %c1_i32_79 = arith.constant 1 : i32
      %152 = tpu.dynamic_rotate %151 by %c1_i32_79 dim 0 : vector<40x128xf32>, i32 -> vector<40x128xf32>
      %153 = arith.addf %137, %152 : vector<40x128xf32>
      %cst_80 = arith.constant 0.194141537 : f32
      %154 = vector.broadcast %cst_80 : f32 to vector<40x128xf32>
      %155 = arith.mulf %154, %119 : vector<40x128xf32>
      %cst_81 = arith.constant -0.189886957 : f32
      %156 = vector.broadcast %cst_81 : f32 to vector<40x128xf32>
      %157 = arith.mulf %156, %120 : vector<40x128xf32>
      %158 = arith.addf %155, %157 : vector<40x128xf32>
      %cst_82 = arith.constant 0.056016732 : f32
      %159 = vector.broadcast %cst_82 : f32 to vector<40x128xf32>
      %160 = arith.mulf %159, %118 : vector<40x128xf32>
      %161 = arith.addf %158, %160 : vector<40x128xf32>
      %cst_83 = arith.constant 0.0250763427 : f32
      %162 = vector.broadcast %cst_83 : f32 to vector<40x128xf32>
      %163 = arith.mulf %162, %121 : vector<40x128xf32>
      %164 = arith.addf %161, %163 : vector<40x128xf32>
      %cst_84 = arith.constant 0.159685522 : f32
      %165 = vector.broadcast %cst_84 : f32 to vector<40x128xf32>
      %166 = arith.mulf %165, %122 : vector<40x128xf32>
      %167 = arith.addf %164, %166 : vector<40x128xf32>
      %168 = arith.addf %153, %167 : vector<40x128xf32>
      %cst_85 = arith.constant 0.173815012 : f32
      %169 = vector.broadcast %cst_85 : f32 to vector<40x128xf32>
      %170 = arith.mulf %169, %119 : vector<40x128xf32>
      %cst_86 = arith.constant 0.13365607 : f32
      %171 = vector.broadcast %cst_86 : f32 to vector<40x128xf32>
      %172 = arith.mulf %171, %120 : vector<40x128xf32>
      %173 = arith.addf %170, %172 : vector<40x128xf32>
      %cst_87 = arith.constant 0.0902464911 : f32
      %174 = vector.broadcast %cst_87 : f32 to vector<40x128xf32>
      %175 = arith.mulf %174, %118 : vector<40x128xf32>
      %176 = arith.addf %173, %175 : vector<40x128xf32>
      %cst_88 = arith.constant 3.941250e-03 : f32
      %177 = vector.broadcast %cst_88 : f32 to vector<40x128xf32>
      %178 = arith.mulf %177, %121 : vector<40x128xf32>
      %179 = arith.addf %176, %178 : vector<40x128xf32>
      %cst_89 = arith.constant -0.188939139 : f32
      %180 = vector.broadcast %cst_89 : f32 to vector<40x128xf32>
      %181 = arith.mulf %180, %122 : vector<40x128xf32>
      %182 = arith.addf %179, %181 : vector<40x128xf32>
      %c39_i32_90 = arith.constant 39 : i32
      %183 = tpu.dynamic_rotate %182 by %c39_i32_90 dim 0 : vector<40x128xf32>, i32 -> vector<40x128xf32>
      %184 = arith.addf %168, %183 : vector<40x128xf32>
      %cst_91 = arith.constant -0.187404498 : f32
      %185 = vector.broadcast %cst_91 : f32 to vector<40x128xf32>
      %186 = arith.mulf %185, %119 : vector<40x128xf32>
      %cst_92 = arith.constant 0.183207512 : f32
      %187 = vector.broadcast %cst_92 : f32 to vector<40x128xf32>
      %188 = arith.mulf %187, %120 : vector<40x128xf32>
      %189 = arith.addf %186, %188 : vector<40x128xf32>
      %cst_93 = arith.constant 0.00752768526 : f32
      %190 = vector.broadcast %cst_93 : f32 to vector<40x128xf32>
      %191 = arith.mulf %190, %118 : vector<40x128xf32>
      %192 = arith.addf %189, %191 : vector<40x128xf32>
      %cst_94 = arith.constant 0.116885662 : f32
      %193 = vector.broadcast %cst_94 : f32 to vector<40x128xf32>
      %194 = arith.mulf %193, %121 : vector<40x128xf32>
      %195 = arith.addf %192, %194 : vector<40x128xf32>
      %cst_95 = arith.constant 0.0208967682 : f32
      %196 = vector.broadcast %cst_95 : f32 to vector<40x128xf32>
      %197 = arith.mulf %196, %122 : vector<40x128xf32>
      %198 = arith.addf %195, %197 : vector<40x128xf32>
      %c38_i32_96 = arith.constant 38 : i32
      %199 = tpu.dynamic_rotate %198 by %c38_i32_96 dim 0 : vector<40x128xf32>, i32 -> vector<40x128xf32>
      %200 = arith.addf %184, %199 : vector<40x128xf32>
      %201 = arith.index_cast %117 : i32 to index
      %202 = memref.load %arg0[%201] : memref<16xf32, #tpu.memory_space<smem>>
      %c0_97 = arith.constant 0 : index
      %c0_98 = arith.constant 0 : index
      %203 = vector.load %arg9[%c0_97, %c0_98] : memref<40x128xf32, #tpu.memory_space<vmem>>, vector<40x128xf32>
      %c0_99 = arith.constant 0 : index
      %c0_100 = arith.constant 0 : index
      %204 = vector.load %arg1[%c0_99, %c0_100] : memref<40x128xf32, #tpu.memory_space<vmem>>, vector<40x128xf32>
      %205 = arith.mulf %204, %200 : vector<40x128xf32>
      %c0_101 = arith.constant 0 : index
      %c0_102 = arith.constant 0 : index
      %206 = vector.load %arg2[%c0_101, %c0_102] : memref<40x128xf32, #tpu.memory_space<vmem>>, vector<40x128xf32>
      %207 = arith.mulf %206, %118 : vector<40x128xf32>
      %208 = arith.addf %205, %207 : vector<40x128xf32>
      %c0_103 = arith.constant 0 : index
      %c0_104 = arith.constant 0 : index
      %209 = vector.load %arg3[%c0_103, %c0_104] : memref<40x128xf32, #tpu.memory_space<vmem>>, vector<40x128xf32>
      %210 = arith.mulf %209, %203 : vector<40x128xf32>
      %211 = arith.subf %208, %210 : vector<40x128xf32>
      %c0_105 = arith.constant 0 : index
      %c0_106 = arith.constant 0 : index
      %212 = vector.load %arg4[%c0_105, %c0_106] : memref<40x128xf32, #tpu.memory_space<vmem>>, vector<40x128xf32>
      %213 = vector.broadcast %202 : f32 to vector<40x128xf32>
      %214 = arith.mulf %213, %212 : vector<40x128xf32>
      %215 = arith.addf %211, %214 : vector<40x128xf32>
      %c0_107 = arith.constant 0 : index
      %c0_108 = arith.constant 0 : index
      %216 = vector.load %arg9[%c0_107, %c0_108] : memref<40x128xf32, #tpu.memory_space<vmem>>, vector<40x128xf32>
      tpu.vector_store %arg9[%c0_107, %c0_108], %215 {strides = array<i32>} : memref<40x128xf32, #tpu.memory_space<vmem>>, vector<40x128xf32>,
      %c0_109 = arith.constant 0 : index
      %c0_110 = arith.constant 0 : index
      %217 = vector.load %arg6[%c0_109, %c0_110] : memref<128x128xf32, #tpu.memory_space<vmem>>, vector<128x128xf32>
      %cst_111 = arith.constant dense<0.000000e+00> : vector<40x128xf32>
      %218 = tpu.matmul %215, %217, %cst_111 {dimension_numbers = #tpu.dot_dimension_numbers<[1], [0], [0], [1], [0, 0, 1, 1], [], []>} : vector<40x128xf32>, vector<128x128xf32>, vector<40x128xf32> -> vector<40x128xf32>
      %c0_112 = arith.constant 0 : index
      %c0_113 = arith.constant 0 : index
      %219 = vector.load %arg5[%c0_112, %c0_113] : memref<40x128xf32, #tpu.memory_space<vmem>>, vector<40x128xf32>
      %220 = arith.mulf %219, %218 : vector<40x128xf32>
      %cst_114 = arith.constant dense<0.000000e+00> : vector<128xf32>
      %221 = vector.multi_reduction <add>, %220, %cst_114 [0] : vector<40x128xf32> to vector<128xf32>
      %222 = vector.shape_cast %221 : vector<128xf32> to vector<1x128xf32>
      %223 = arith.index_cast %117 : i32 to index
      %c0_115 = arith.constant 0 : index
      %224 = vector.load %arg7[%223, %c0_115] : memref<16x128xf32, #tpu.memory_space<vmem>>, vector<1x128xf32>
      tpu.vector_store %arg7[%223, %c0_115], %222 {strides = array<i32>} : memref<16x128xf32, #tpu.memory_space<vmem>>, vector<1x128xf32>,
    }
    %c8_i32_4 = arith.constant 8 : i32
    %c0_5 = arith.constant 0 : index
    %c0_6 = arith.constant 0 : index
    %5 = vector.load %arg9[%c0_5, %c0_6] : memref<40x128xf32, #tpu.memory_space<vmem>>, vector<40x128xf32>
    %c0_7 = arith.constant 0 : index
    %c0_8 = arith.constant 0 : index
    %6 = vector.load %arg8[%c0_7, %c0_8] : memref<40x128xf32, #tpu.memory_space<vmem>>, vector<40x128xf32>
    tpu.vector_store %arg8[%c0_7, %c0_8], %5 {strides = array<i32>} : memref<40x128xf32, #tpu.memory_space<vmem>>, vector<40x128xf32>,
    return
  }
}

</mosaic_0001>

<bundles_post_ra>
// kernel: tpu_custom_call.1
= control target key start
LH: loop header
LB: loop body
LE: loop exit
PB: predicated region body
PF: predicated region fallthrough
CT: control target
= control target key end

     0   :  { %14 = vsyncpa [#allocation7], 0  ;;  %s2628_s0 = inlined_call_operand.hbm [shape: f32[16], index: 0, kind: input, shape index: {}]   ;;  %s2629_s1 = inlined_call_operand.hbm [shape: f32[40,128], index: 1, kind: input, shape index: {}]   ;;  %s2630_s2 = inlined_call_operand.hbm [shape: f32[40,128], index: 2, kind: input, shape index: {}]   ;;  %s2631_s3 = inlined_call_operand.hbm [shape: f32[40,128], index: 3, kind: input, shape index: {}]   ;;  %s2632_s4 = inlined_call_operand.hbm [shape: f32[40,128], index: 4, kind: input, shape index: {}]   ;;  %s2633_s5 = inlined_call_operand.hbm [shape: f32[40,128], index: 5, kind: input, shape index: {}]   ;;  %s2634_s6 = inlined_call_operand.hbm [shape: f32[128,128], index: 6, kind: input, shape index: {}]   ;;  %s2635_s7 = inlined_call_operand.hbm [shape: f32[16,128], index: 7, kind: output, shape index: {0}]   ;;  %s2636_s8 = inlined_call_operand.hbm [shape: f32[40,128], index: 8, kind: output, shape index: {1}]  }
   0x1   :  { %15 = vsyncpa [#allocation5], 0 }
   0x2   :  { %16 = vsyncpa [#allocation10], 0 }
   0x3   :  { %17 = vsyncpa [#allocation13], 0 }
   0x4   :  { %18 = vsyncpa [#allocation16], 0 }
   0x5   :  { %19 = vsyncpa [#allocation6], 0 }
   0x6   :  { %20 = vsyncpa [#allocation19], 0  ;;  %s1677_s27 = smov [#allocation9]   ;;  %s1678_s29 = smov [#allocation12]  }
   0x7   :  { %s46_s28 = sshll.u32 %s1677_s27, 4  ;;  %s70_s30 = sshll.u32 %s1678_s29, 4  ;;  %s47_s28 = int_to_ptr.vmem [resolvable:$true] %s46_s28  ;;  %s1741_s30 = int_to_ptr.vmem [resolvable:$true] %s70_s30 }
   0x8   :  { %s1469_s11 = scalar_lea.hbm %s2630_s2, 640 }
   0x9   :  { %p1470_p0 = scmp.ne.s32.totalorder %s2630_s2, %s1469_s11  ;;  %p1473_p1 = scmp.lt.u32.totalorder %s1469_s11, %s2630_s2 }
   0xb   :  { %p1475_p2 = pnand %p1473_p1, %p1470_p0 }
   0xd   :  { %1478 = shalt.err (!%p1475_p2)
}
   0xe   :  { %s1479_s16 = scalar_lea.vmem %s47_s28, 640  ;;  %p1484_p4 = scmp.lt.s32.totalorder %s47_s28, %s47_s28 }
   0xf   :  { %p1480_p3 = scmp.ne.s32.totalorder %s47_s28, %s1479_s16  ;;  %p1485_p5 = scmp.lt.s32.totalorder %s1479_s16, %s1479_s16 }
  0x11   :  { %p1486_p6 = por %p1485_p5, %p1484_p4 }
  0x13   :  { %p1487_p7 = pnand %p1486_p6, %p1480_p3 }
  0x15   :  { %1490 = shalt.err (!%p1487_p7)
}
  0x16   :  { %s1679_s17 = smov 128   ;;  %s1680_s18 = smov 8  }
  0x17   :  { %52 = dma.hbm_to_vmem [thread:$0]  %s2630_s2, 640, %s47_s28, [#allocation10], %s1679_s17, %s1679_s17, %s1680_s18  }
  0x18   :  { %s1491_s23 = scalar_lea.hbm %s2632_s4, 640 }
  0x19   :  { %p1492_p8 = scmp.ne.s32.totalorder %s2632_s4, %s1491_s23  ;;  %p1495_p9 = scmp.lt.u32.totalorder %s1491_s23, %s2632_s4 }
  0x1b   :  { %p1497_p10 = pnand %p1495_p9, %p1492_p8 }
  0x1d   :  { %1500 = shalt.err (!%p1497_p10)
}
  0x1e   :  { %s1501_s29 = scalar_lea.vmem %s1741_s30, 640  ;;  %p1506_p12 = scmp.lt.s32.totalorder %s1741_s30, %s1741_s30 }
  0x1f   :  { %p1502_p11 = scmp.ne.s32.totalorder %s1741_s30, %s1501_s29  ;;  %p1507_p13 = scmp.lt.s32.totalorder %s1501_s29, %s1501_s29 }
  0x21   :  { %p1508_p0 = por %p1507_p13, %p1506_p12 }
  0x23   :  { %p1509_p1 = pnand %p1508_p0, %p1502_p11 }
  0x25   :  { %1512 = shalt.err (!%p1509_p1)
}
  0x26   :  { %76 = dma.hbm_to_vmem [thread:$0]  %s2632_s4, 640, %s1741_s30, [#allocation13], %s1679_s17, %s1679_s17, %s1680_s18  }
  0x27   :  { %s1513_s11 = scalar_lea.hbm %s2628_s0, 16 }
  0x28   :  { %p1514_p2 = scmp.ne.s32.totalorder %s2628_s0, %s1513_s11  ;;  %p1517_p3 = scmp.lt.u32.totalorder %s1513_s11, %s2628_s0 }
  0x2a   :  { %p1519_p4 = pnand %p1517_p3, %p1514_p2 }
  0x2c   :  { %1522 = shalt.err (!%p1519_p4)
}
  0x2d   :  { %s1681_s16 = smov [#allocation4]   ;;  %s1682_s4 = smov [#allocation8]  }
  0x2e   :  { %28 = dma.hbm_to_smem %s2628_s0, 16, %s1681_s16, [#allocation7]  }
  0x2f   :  { %s34_s30 = sshll.u32 %s1682_s4, 4  ;;  %s1683_s21 = smov [#allocation11]   ;;  %s35_s30 = int_to_ptr.vmem [resolvable:$true] %s34_s30 }
  0x30   :  { %s58_s22 = sshll.u32 %s1683_s21, 4  ;;  %s1523_s25 = scalar_lea.hbm %s2629_s1, 640  ;;  %s59_s22 = int_to_ptr.vmem [resolvable:$true] %s58_s22 }
  0x31   :  { %p1524_p5 = scmp.ne.s32.totalorder %s2629_s1, %s1523_s25  ;;  %p1527_p6 = scmp.lt.u32.totalorder %s1523_s25, %s2629_s1 }
  0x33   :  { %p1529_p7 = pnand %p1527_p6, %p1524_p5 }
  0x35   :  { %1532 = shalt.err (!%p1529_p7)
}
  0x36   :  { %s1533_s0 = scalar_lea.vmem %s35_s30, 640  ;;  %p1538_p9 = scmp.lt.s32.totalorder %s35_s30, %s35_s30 }
  0x37   :  { %p1534_p8 = scmp.ne.s32.totalorder %s35_s30, %s1533_s0  ;;  %p1539_p10 = scmp.lt.s32.totalorder %s1533_s0, %s1533_s0 }
  0x39   :  { %p1540_p11 = por %p1539_p10, %p1538_p9 }
  0x3b   :  { %p1541_p12 = pnand %p1540_p11, %p1534_p8 }
  0x3d   :  { %1544 = shalt.err (!%p1541_p12)
}
  0x3e   :  { %40 = dma.hbm_to_vmem [thread:$0]  %s2629_s1, 640, %s35_s30, [#allocation5], %s1679_s17, %s1679_s17, %s1680_s18  }
  0x3f   :  { %s1545_s12 = scalar_lea.hbm %s2631_s3, 640 }
  0x40   :  { %p1546_p13 = scmp.ne.s32.totalorder %s2631_s3, %s1545_s12  ;;  %p1549_p0 = scmp.lt.u32.totalorder %s1545_s12, %s2631_s3 }
  0x42   :  { %p1551_p1 = pnand %p1549_p0, %p1546_p13 }
  0x44   :  { %1554 = shalt.err (!%p1551_p1)
}
  0x45   :  { %s1555_s19 = scalar_lea.vmem %s59_s22, 640  ;;  %p1560_p3 = scmp.lt.s32.totalorder %s59_s22, %s59_s22 }
  0x46   :  { %p1556_p2 = scmp.ne.s32.totalorder %s59_s22, %s1555_s19  ;;  %p1561_p4 = scmp.lt.s32.totalorder %s1555_s19, %s1555_s19 }
  0x48   :  { %p1562_p5 = por %p1561_p4, %p1560_p3 }
  0x4a   :  { %p1563_p6 = pnand %p1562_p5, %p1556_p2 }
  0x4c   :  { %1566 = shalt.err (!%p1563_p6)
}
  0x4d   :  { %64 = dma.hbm_to_vmem [thread:$0]  %s2631_s3, 640, %s59_s22, [#allocation10], %s1679_s17, %s1679_s17, %s1680_s18  }
  0x4e   :  { %s1684_s4 = smov [#allocation14]   ;;  %s1685_s21 = smov [#allocation15]  }
  0x4f   :  { %s82_s30 = sshll.u32 %s1684_s4, 4  ;;  %s94_s23 = sshll.u32 %s1685_s21, 4  ;;  %s83_s30 = int_to_ptr.vmem [resolvable:$true] %s82_s30  ;;  %s95_s23 = int_to_ptr.vmem [resolvable:$true] %s94_s23 }
  0x50   :  { %s1567_s26 = scalar_lea.hbm %s2633_s5, 640 }
  0x51   :  { %p1568_p7 = scmp.ne.s32.totalorder %s2633_s5, %s1567_s26  ;;  %p1571_p8 = scmp.lt.u32.totalorder %s1567_s26, %s2633_s5 }
  0x53   :  { %p1573_p9 = pnand %p1571_p8, %p1568_p7 }
  0x55   :  { %1576 = shalt.err (!%p1573_p9)
}
  0x56   :  { %s1577_s3 = scalar_lea.vmem %s83_s30, 640  ;;  %p1582_p11 = scmp.lt.s32.totalorder %s83_s30, %s83_s30 }
  0x57   :  { %p1578_p10 = scmp.ne.s32.totalorder %s83_s30, %s1577_s3  ;;  %p1583_p12 = scmp.lt.s32.totalorder %s1577_s3, %s1577_s3 }
  0x59   :  { %p1584_p13 = por %p1583_p12, %p1582_p11 }
  0x5b   :  { %p1585_p0 = pnand %p1584_p13, %p1578_p10 }
  0x5d   :  { %1588 = shalt.err (!%p1585_p0)
}
  0x5e   :  { %88 = dma.hbm_to_vmem [thread:$0]  %s2633_s5, 640, %s83_s30, [#allocation13], %s1679_s17, %s1679_s17, %s1680_s18  }
  0x5f   :  { %s1589_s11 = scalar_lea.hbm %s2634_s6, 2048 }
  0x60   :  { %p1590_p1 = scmp.ne.s32.totalorder %s2634_s6, %s1589_s11  ;;  %p1593_p2 = scmp.lt.u32.totalorder %s1589_s11, %s2634_s6 }
  0x62   :  { %p1595_p3 = pnand %p1593_p2, %p1590_p1 }
  0x64   :  { %1598 = shalt.err (!%p1595_p3)
}
  0x65   :  { %s1599_s16 = scalar_lea.vmem %s95_s23, 2048  ;;  %p1604_p5 = scmp.lt.s32.totalorder %s95_s23, %s95_s23 }
  0x66   :  { %p1600_p4 = scmp.ne.s32.totalorder %s95_s23, %s1599_s16  ;;  %p1605_p6 = scmp.lt.s32.totalorder %s1599_s16, %s1599_s16 }
  0x68   :  { %p1606_p7 = por %p1605_p6, %p1604_p5 }
  0x6a   :  { %p1607_p8 = pnand %p1606_p7, %p1600_p4 }
  0x6c   :  { %1610 = shalt.err (!%p1607_p8)
}
  0x6d   :  { %100 = dma.hbm_to_vmem [thread:$0]  %s2634_s6, 2048, %s95_s23, [#allocation16], %s1679_s17, %s1679_s17, %s1680_s18  }
  0x6e   :  { %1659 = dma.done.wait [#allocation7], 16  }
  0x6f   :  { %1660 = vsyncadd [#allocation7], 4294967280 }
  0x70   :  { %1661 = dma.done.wait [#allocation5], 640  }
  0x71   :  { %1662 = vsyncadd [#allocation5], 4294966656 }
  0x72   :  { %1663 = dma.done.wait [#allocation10], 1280  }
  0x73   :  { %1664 = vsyncadd [#allocation10], 4294966016 }
  0x74   :  { %1665 = dma.done.wait [#allocation13], 1280  }
  0x75   :  { %1666 = vsyncadd [#allocation13], 4294966016 }
  0x76   :  { %1667 = dma.done.wait [#allocation16], 2048  }
  0x77   :  { %1668 = vsyncadd [#allocation16], 4294965248 }
  0x78   :  { %122 = sfence }
  0x79   :  { %v1686_v0 = vmov 0.0   ;;  %s1850_s6 = smov 0  }
  0x7a   :  { %123 = vst [vmem:[#allocation2] sm:$0xff] %v1686_v0  ;;  %124 = vst [vmem:[#allocation2 + $0x8] sm:$0xff] %v1686_v0 }
  0x7b   :  { %125 = vst [vmem:[#allocation2 + $0x10] sm:$0xff] %v1686_v0  ;;  %126 = vst [vmem:[#allocation2 + $0x18] sm:$0xff] %v1686_v0 }
  0x7c   :  { %127 = vst [vmem:[#allocation2 + $0x20] sm:$0xff] %v1686_v0  ;;  %128 = vst [vmem:[#allocation3] sm:$0xff] %v1686_v0 }
  0x7d   :  { %129 = vst [vmem:[#allocation3 + $0x8] sm:$0xff] %v1686_v0  ;;  %130 = vst [vmem:[#allocation3 + $0x10] sm:$0xff] %v1686_v0 }
  0x7e   :  { %131 = vst [vmem:[#allocation3 + $0x18] sm:$0xff] %v1686_v0  ;;  %132 = vst [vmem:[#allocation3 + $0x20] sm:$0xff] %v1686_v0 }
  0x7f LB: > { %s1687_s1 = smov 2   ;;  %s1688_s20 = smov 1   ;;  %v543_v5 = vld [vmem:[#allocation15] sm:$0xff]  ;;  %v544_v6 = vld [vmem:[#allocation15 + $0x8] sm:$0xff]  ;;  %v1691_v8 = vmov 0.0|0.0   ;;  %v545_v10 = vld [vmem:[#allocation15 + $0x10] sm:$0xff]  ;;  %v235_v47 = vlaneseq  ;;  %s1675_s6 = sphi %s1850_s6, %s138_s6  }
  0x80   : > { %s1689_s4 = smov 127   ;;  %s1690_s30 = smov 126   ;;  %v1394_v7 = vpack.c.bf16 %v544_v6, %v543_v5  ;;  %1393 = vmatprep.subr.bf16.mxu0 %v1691_v8  ;;  %1417 = vmatprep.subr.bf16.mxu1 %v1691_v8  ;;  %v546_v11 = vld [vmem:[#allocation15 + $0x18] sm:$0xff]  ;;  %v547_v13 = vld [vmem:[#allocation15 + $0x20] sm:$0xff]  ;;  %v548_v14 = vld [vmem:[#allocation15 + $0x28] sm:$0xff]  ;;  %vm1692_vm0 = vmmov 0  }
  0x81   : > { %v1857_v2 = vld [vmem:[#allocation2] sm:$0xff]  ;;  %v1873_v4 = vld [vmem:[#allocation2 + $0x8] sm:$0xff]  ;;  %v1397_v12 = vpack.c.bf16 %v546_v11, %v545_v10  ;;  %v1400_v15 = vpack.c.bf16 %v548_v14, %v547_v13  ;;  %v550_v17 = vld [vmem:[#allocation15 + $0x38] sm:$0xff]  ;;  %v2637_v24 = vmov 0.0   ;;  %s1932_s21 = sshll.u32 %s1675_s6, 1  ;;  %v2005_v61 = vshrl.u32 %v235_v47, 7 }
  0x82   : > { %145 = vrot.lane.b32.xlu0 %v1857_v2, %s1687_s1  ;;  %v1863_v3 = vld [vmem:[#allocation2 + $0x18] sm:$0xff]  ;;  %2666 = vst [vmem:[#allocation28_spill] sm:$0xff] %v1873_v4  ;;  %1395 = vmatpush3.bf16.msra.mxu0 %v1394_v7  ;;  %v1895_v9 = vld [vmem:[#allocation2 + $0x10] sm:$0xff]  ;;  %v549_v16 = vld [vmem:[#allocation15 + $0x30] sm:$0xff]  ;;  %v1944_v37 = vmul.f32 -0.06708341, %v1857_v2 }
  0x83   : > { %v1855_v1 = vld [vmem:[#allocation2 + $0x20] sm:$0xff]  ;;  %2665 = vst [vmem:[#allocation27_spill] sm:$0xff] %v1863_v3  ;;  %1419 = vmatpush3.bf16.msra.mxu1 %v1394_v7  ;;  %1396 = vmatprep.subr.bf16.mxu0 %v1691_v8  ;;  %2667 = vst [vmem:[#allocation29_spill] sm:$0xff] %v1895_v9  ;;  %v1403_v18 = vpack.c.bf16 %v550_v17, %v549_v16  ;;  %v551_v19 = vld [vmem:[#allocation15 + $0x40] sm:$0xff]  ;;  %v1926_v32 = vmul.f32 -0.06708341, %v1863_v3 }
  0x84   : > { %153 = vrot.lane.b32.xlu1 %v1855_v1, %s1687_s1  ;;  %1420 = vmatprep.subr.bf16.mxu1 %v1691_v8  ;;  %v552_v20 = vld [vmem:[#allocation15 + $0x48] sm:$0xff]  ;;  %v553_v22 = vld [vmem:[#allocation15 + $0x50] sm:$0xff]  ;;  %v554_v23 = vld [vmem:[#allocation15 + $0x58] sm:$0xff]  ;;  %v1929_v33 = vmul.f32 0.075792216, %v1863_v3  ;;  %s1959_s23 = sld [smem:[#allocation4 + %s1932_s21]] }
  0x85   : > { %v1406_v21 = vpack.c.bf16 %v552_v20, %v551_v19  ;;  %1331 = vmatprep.mubr.msk.f32.mxu0 %vm1692_vm0, %v2637_v24  ;;  %1378 = vmatprep.mubr.msk.f32.mxu1 %vm1692_vm0, %v2637_v24  ;;  %v1409_v25 = vpack.c.bf16 %v554_v23, %v553_v22  ;;  %v555_v26 = vld [vmem:[#allocation15 + $0x60] sm:$0xff]  ;;  %v556_v27 = vld [vmem:[#allocation15 + $0x68] sm:$0xff]  ;;  %v557_v29 = vld [vmem:[#allocation15 + $0x70] sm:$0xff]  ;;  %v1935_v34 = vmul.f32 0.056016732, %v1863_v3  ;;  %vm237_vm1 = vcmp.lt.s32.totalorder %v2005_v61, 2 }
  0x86   : > { %151 = vrot.lane.b32.xlu0 %v1863_v3, %s1687_s1  ;;  %1398 = vmatpush3.bf16.msra.mxu0 %v1397_v12  ;;  %v1412_v28 = vpack.c.bf16 %v556_v27, %v555_v26  ;;  %v558_v30 = vld [vmem:[#allocation15 + $0x78] sm:$0xff]  ;;  %v1938_v35 = vmul.f32 0.09024649, %v1863_v3  ;;  %v1941_v36 = vmul.f32 0.0075276853, %v1863_v3  ;;  %v1994_v54 = vld [vmem:[#allocation9] sm:$0xff] }
  0x87   : > { %1422 = vmatpush3.bf16.msra.mxu1 %v1397_v12  ;;  %1399 = vmatprep.subr.bf16.mxu0 %v1691_v8  ;;  %v1415_v31 = vpack.c.bf16 %v558_v30, %v557_v29  ;;  %v1947_v38 = vmul.f32 0.075792216, %v1857_v2  ;;  %v1950_v39 = vmul.f32 0.056016732, %v1857_v2  ;;  %v1953_v40 = vmul.f32 0.09024649, %v1857_v2 }
  0x88   : > { %155 = vrot.lane.b32.xlu1 %v1857_v2, %s1688_s20  ;;  %1423 = vmatprep.subr.bf16.mxu1 %v1691_v8  ;;  %v1956_v41 = vmul.f32 0.0075276853, %v1857_v2  ;;  %v1962_v42 = vmul.f32 -0.06708341, %v1855_v1  ;;  %v1965_v43 = vmul.f32 0.075792216, %v1855_v1 }
  0x89   : > { %v1968_v44 = vmul.f32 0.056016732, %v1855_v1  ;;  %v1971_v45 = vmul.f32 0.09024649, %v1855_v1  ;;  %v1974_v46 = vmul.f32 0.0075276853, %v1855_v1 }
  0x8a   : > { %161 = vrot.lane.b32.xlu0 %v1863_v3, %s1688_s20  ;;  %1401 = vmatpush3.bf16.msra.mxu0 %v1400_v15  ;;  %v1977_v48 = vmul.f32 -0.06708341, %v1873_v4  ;;  %v1980_v49 = vmul.f32 0.075792216, %v1873_v4  ;;  %v1983_v50 = vmul.f32 0.056016732, %v1873_v4  ;;  %v2020_v16 = vstv %s1959_s23 }
  0x8b   : > { %1425 = vmatpush3.bf16.msra.mxu1 %v1400_v15  ;;  %1402 = vmatprep.subr.bf16.mxu0 %v1691_v8  ;;  %v1986_v51 = vmul.f32 0.09024649, %v1873_v4  ;;  %v1989_v52 = vmul.f32 0.0075276853, %v1873_v4  ;;  %v1992_v53 = vmul.f32 -0.06708341, %v1895_v9 }
  0x8c   : > { %163 = vrot.lane.b32.xlu1 %v1855_v1, %s1688_s20  ;;  %1426 = vmatprep.subr.bf16.mxu1 %v1691_v8  ;;  %2668 = vst [vmem:[#allocation30_spill] sm:$0xff] %v1994_v54  ;;  %v496_v55 = vld [vmem:[#allocation9 + $0x20] sm:$0xff]  ;;  %v1997_v58 = vmul.f32 0.075792216, %v1895_v9  ;;  %v2000_v59 = vmul.f32 0.056016732, %v1895_v9 }
  0x8d   : > { %v2003_v60 = vmul.f32 0.09024649, %v1895_v9  ;;  %v2008_v62 = vmul.f32 0.0075276853, %v1895_v9  ;;  %v477_v63 = vld [vmem:[#allocation3] sm:$0xff]  ;;  %v2010_v5 = vld [vmem:[#allocation11] sm:$0xff]  ;;  %v2017_v10 = vmul.f32 %v496_v55, %v1855_v1 }
  0x8e   : > { %147 = vrot.lane.b32.xlu0 %v1873_v4, %s1687_s1  ;;  %1404 = vmatpush3.bf16.msra.mxu0 %v1403_v18  ;;  %v481_v0 = vld [vmem:[#allocation3 + $0x20] sm:$0xff]  ;;  %2670 = vst [vmem:[#allocation32_spill] sm:$0xff] %v2010_v5  ;;  %v511_v11 = vld [vmem:[#allocation11 + $0x20] sm:$0xff]  ;;  %2673 = vst [vmem:[#allocation35_spill] sm:$0xff] %v2020_v16  ;;  %v2023_v22 = vmul.f32 %v2010_v5, %v477_v63  ;;  %vm293_vm2 = vcmp.lt.s32.totalorder %v2005_v61, 1  ;;  %vm404_vm3 = vcmp.lt.s32.totalorder %v2005_v61, 7 }
  0x8f   : > { %1428 = vmatpush3.bf16.msra.mxu1 %v1403_v18  ;;  %1405 = vmatprep.subr.bf16.mxu0 %v1691_v8  ;;  %2669 = vst [vmem:[#allocation31_spill] sm:$0xff] %v2008_v62  ;;  %2672 = vst [vmem:[#allocation34_spill] sm:$0xff] %v2017_v10  ;;  %v526_v12 = vld [vmem:[#allocation12 + $0x20] sm:$0xff]  ;;  %vm465_vm4 = vcmp.lt.s32.totalorder %v2005_v61, 6  ;;  %s671_s24 = sadd.s32 1, %s1932_s21  ;;  %s669_s26 = scalar_lea.vmem [#allocation17], %s1932_s21 }
  0x90   : > { %157 = vrot.lane.b32.xlu1 %v1873_v4, %s1688_s20  ;;  %1429 = vmatprep.subr.bf16.mxu1 %v1691_v8  ;;  %2674 = vst [vmem:[#allocation36_spill] sm:$0xff] %v2023_v22  ;;  %v2028_v29 = vmul.f32 %v2020_v16, %v526_v12  ;;  %s1002_s25 = sld [smem:[#allocation4 + %s671_s24]]  ;;  %s138_s6 = sadd.s32 1, %s1675_s6  }
  0x91   : > { %p135_p9 = scmp.ge.s32.totalorder %s138_s6, 8  }
  0x92   : > { %165 = vrot.lane.b32.xlu0 %v1857_v2, %s1689_s4  ;;  %1407 = vmatpush3.bf16.msra.mxu0 %v1406_v21  ;;  %2676 = vst [vmem:[#allocation38_spill] sm:$0xff] %v2028_v29  ;;  %s1694_s27 = smov (%p135_p9), [#allocation17]   ;;  %s1695_s2 = smov (%p135_p9), [#allocation18]  }
  0x93   : > { %1431 = vmatpush3.bf16.msra.mxu1 %v1406_v21  ;;  %1408 = vmatprep.subr.bf16.mxu0 %v1691_v8  ;;  %s1212_s29 = sshll.u32 (%p135_p9), %s1694_s27, 4  ;;  %s1224_s0 = sshll.u32 (%p135_p9), %s1695_s2, 4  ;;  %s1213_s29 = int_to_ptr.vmem [resolvable:$true] %s1212_s29  ;;  %s2591_s0 = int_to_ptr.vmem [resolvable:$true] %s1224_s0 }
  0x94   : > { %171 = vrot.lane.b32.xlu1 %v1863_v3, %s1689_s4  ;;  %1432 = vmatprep.subr.bf16.mxu1 %v1691_v8  ;;  %s1611_s3 = scalar_lea.vmem (%p135_p9), %s1213_s29, 256  ;;  %p1616_p11 = scmp.lt.s32.totalorder (%p135_p9), %s1213_s29, %s1213_s29 }
  0x95   :  { %p1612_p10 = scmp.ne.s32.totalorder (%p135_p9), %s1213_s29, %s1611_s3  ;;  %p1617_p12 = scmp.lt.s32.totalorder (%p135_p9), %s1611_s3, %s1611_s3 }
  0x96   : > { %173 = vrot.lane.b32.xlu0 %v1855_v1, %s1689_s4  ;;  %1410 = vmatpush3.bf16.msra.mxu0 %v1409_v25 }
  0x97   : > { %1434 = vmatpush3.bf16.msra.mxu1 %v1409_v25  ;;  %1411 = vmatprep.subr.bf16.mxu0 %v1691_v8  ;;  %p1618_p13 = por (%p135_p9), %p1617_p12, %p1616_p11 }
  0x98   : > { %175 = vrot.lane.b32.xlu1 %v1857_v2, %s1690_s30  ;;  %1435 = vmatprep.subr.bf16.mxu1 %v1691_v8 }
  0x99   :  { %p1619_p0 = pnand (%p135_p9), %p1618_p13, %p1612_p10 }
  0x9a   : > { %181 = vrot.lane.b32.xlu0 %v1863_v3, %s1690_s30  ;;  %1413 = vmatpush3.bf16.msra.mxu0 %v1412_v28 }
  0x9b   : > { %1437 = vmatpush3.bf16.msra.mxu1 %v1412_v28  ;;  %1414 = vmatprep.subr.bf16.mxu0 %v1691_v8 }
  0x9c   : > { %183 = vrot.lane.b32.xlu1 %v1855_v1, %s1690_s30  ;;  %1438 = vmatprep.subr.bf16.mxu1 %v1691_v8  ;;  %v2014_v8 = vmul.f32 %v1994_v54, %v1857_v2  ;;  %v2025_v1 = vmul.f32 %v511_v11, %v481_v0 }
  0x9e   : > { %149 = vrot.lane.b32.xlu0 %v1895_v9, %s1687_s1  ;;  %1416 = vmatpush3.bf16.msra.mxu0 %v1415_v31  ;;  %2671 = vst [vmem:[#allocation33_spill] sm:$0xff] %v2014_v8  ;;  %2675 = vst [vmem:[#allocation37_spill] sm:$0xff] %v2025_v1 }
  0x9f   : > { %1440 = vmatpush3.bf16.msra.mxu1 %v1415_v31 }
  0xa0   : > { %159 = vrot.lane.b32.xlu1 %v1895_v9, %s1688_s20 }
  0xa2   : > { %167 = vrot.lane.b32.xlu0 %v1873_v4, %s1689_s4 }
  0xa4   : > { %177 = vrot.lane.b32.xlu1 %v1873_v4, %s1690_s30 }
  0xa6   : > { %169 = vrot.lane.b32.xlu0 %v1895_v9, %s1689_s4 }
  0xa8   : > { %179 = vrot.lane.b32.xlu1 %v1895_v9, %s1690_s30 }
  0xf4   : > { %v146_v57 = vpop.permute.xlu0 %145 }
  0xf5   : > { %v185_v17 = vmul.f32 0.1790668, %v146_v57  ;;  %v243_v18 = vmul.f32 -0.1337988, %v146_v57  ;;  %v304_v19 = vmul.f32 0.19414154, %v146_v57 }
  0xf6   : > { %v154_v56 = vpop.permute.xlu1 %153  ;;  %v354_v26 = vmul.f32 0.17381501, %v146_v57  ;;  %v415_v30 = vmul.f32 -0.1874045, %v146_v57 }
  0xf7   : > { %v189_v6 = vmul.f32 0.1790668, %v154_v56  ;;  %v247_v7 = vmul.f32 -0.1337988, %v154_v56  ;;  %v308_v13 = vmul.f32 0.19414154, %v154_v56 }
  0xf8   : > { %v358_v14 = vmul.f32 0.17381501, %v154_v56  ;;  %v419_v15 = vmul.f32 -0.1874045, %v154_v56  ;;  %v152_v21 = vpop.permute.xlu0 %151 }
  0xf9   : > { %v188_v55 = vmul.f32 0.1790668, %v152_v21  ;;  %v246_v24 = vmul.f32 -0.1337988, %v152_v21  ;;  %v307_v63 = vmul.f32 0.19414154, %v152_v21 }
  0xfa   : > { %v156_v20 = vpop.permute.xlu1 %155  ;;  %v357_v5 = vmul.f32 0.17381501, %v152_v21  ;;  %v418_v0 = vmul.f32 -0.1874045, %v152_v21 }
  0xfb   : > { %v190_v2 = vmul.f32 0.19143195, %v156_v20  ;;  %v248_v23 = vmul.f32 -0.075922154, %v156_v20  ;;  %v309_v25 = vmul.f32 -0.18988696, %v156_v20 }
  0xfc   : > { %v359_v27 = vmul.f32 0.13365607, %v156_v20  ;;  %v420_v28 = vmul.f32 0.18320751, %v156_v20  ;;  %v162_v3 = vpop.permute.xlu0 %161 }
  0xfd   : > { %v195_v31 = vadd.f32 %v190_v2, %v185_v17  ;;  %v253_v47 = vadd.f32 %v248_v23, %v243_v18  ;;  %v2030_v56 = vadd.f32 %v309_v25, %v304_v19  ;;  %v193_v17 = vmul.f32 0.19143195, %v162_v3 }
  0xfe   : > { %v164_v54 = vpop.permute.xlu1 %163  ;;  %v2032_v9 = vadd.f32 %v359_v27, %v354_v26  ;;  %v2034_v20 = vadd.f32 %v420_v28, %v415_v30  ;;  %v251_v18 = vmul.f32 -0.075922154, %v162_v3  ;;  %v312_v21 = vmul.f32 -0.18988696, %v162_v3 }
  0xff   : > { %v194_v11 = vmul.f32 0.19143195, %v164_v54  ;;  %v252_v22 = vmul.f32 -0.075922154, %v164_v54  ;;  %v313_v12 = vmul.f32 -0.18988696, %v164_v54  ;;  %v205_v19 = vadd.f32 %v1944_v37, %v195_v31 }
 0x100   : > { %v363_v4 = vmul.f32 0.13365607, %v164_v54  ;;  %v424_v57 = vmul.f32 0.18320751, %v164_v54  ;;  %v263_v2 = vadd.f32 %v1947_v38, %v253_v47  ;;  %v148_v8 = vpop.permute.xlu0 %147  ;;  %v362_v54 = vmul.f32 0.13365607, %v162_v3 }
 0x101   : > { %v2038_v23 = vadd.f32 %v194_v11, %v189_v6  ;;  %v2040_v25 = vadd.f32 %v252_v22, %v247_v7  ;;  %v2042_v26 = vadd.f32 %v313_v12, %v308_v13  ;;  %v423_v29 = vmul.f32 0.18320751, %v162_v3 }
 0x102   : > { %v158_v27 = vpop.permute.xlu1 %157  ;;  %v2044_v28 = vadd.f32 %v363_v4, %v358_v14  ;;  %v2046_v30 = vadd.f32 %v424_v57, %v419_v15  ;;  %v198_v16 = vadd.f32 %v193_v17, %v188_v55  ;;  %v256_v1 = vadd.f32 %v251_v18, %v246_v24 }
 0x103   : > { %v191_v37 = vmul.f32 0.19143195, %v158_v27  ;;  %v249_v31 = vmul.f32 -0.075922154, %v158_v27  ;;  %v317_v38 = vadd.f32 %v312_v21, %v307_v63  ;;  %v310_v6 = vmul.f32 -0.18988696, %v158_v27 }
 0x104   : > { %v360_v47 = vmul.f32 0.13365607, %v158_v27  ;;  %v421_v7 = vmul.f32 0.18320751, %v158_v27  ;;  %v367_v22 = vadd.f32 %v362_v54, %v357_v5  ;;  %v186_v13 = vmul.f32 0.1790668, %v148_v8  ;;  %v166_v63 = vpop.permute.xlu0 %165 }
 0x105   : > { %v244_v11 = vmul.f32 -0.1337988, %v148_v8  ;;  %v305_v12 = vmul.f32 0.19414154, %v148_v8  ;;  %v428_v62 = vadd.f32 %v423_v29, %v418_v0  ;;  %v355_v4 = vmul.f32 0.17381501, %v148_v8 }
 0x106   : > { %v172_v10 = vpop.permute.xlu1 %171  ;;  %v416_v14 = vmul.f32 -0.1874045, %v148_v8  ;;  %v2048_v57 = vadd.f32 %v191_v37, %v186_v13  ;;  %v208_v3 = vadd.f32 %v1926_v32, %v198_v16  ;;  %v266_v24 = vadd.f32 %v1929_v33, %v256_v1 }
 0x107   : > { %v213_v15 = vmul.f32 -0.012532616, %v172_v10  ;;  %v271_v55 = vmul.f32 0.098706625, %v172_v10  ;;  %v2052_v17 = vadd.f32 %v249_v31, %v244_v11  ;;  %v2054_v18 = vadd.f32 %v310_v6, %v305_v12 }
 0x108   : > { %v2056_v5 = vadd.f32 %v360_v47, %v355_v4  ;;  %v2058_v21 = vadd.f32 %v421_v7, %v416_v14  ;;  %v327_v8 = vadd.f32 %v1935_v34, %v317_v38  ;;  %v332_v0 = vmul.f32 0.025076343, %v172_v10  ;;  %v174_v14 = vpop.permute.xlu0 %173 }
 0x109   : > { %v2060_v29 = vadd.f32 %v213_v15, %v208_v3  ;;  %v382_v27 = vmul.f32 0.00394125, %v172_v10  ;;  %v2063_v54 = vadd.f32 %v271_v55, %v266_v24  ;;  %v377_v32 = vadd.f32 %v1938_v35, %v367_v22 }
 0x10a   : > { %v210_v33 = vmul.f32 -0.012532616, %v166_v63  ;;  %v268_v16 = vmul.f32 0.098706625, %v166_v63  ;;  %v2066_v1 = vadd.f32 %v332_v0, %v327_v8  ;;  %v438_v37 = vadd.f32 %v1941_v36, %v428_v62  ;;  %v176_v47 = vpop.permute.xlu1 %175 }
 0x10b   : > { %v443_v31 = vmul.f32 0.11688566, %v172_v10  ;;  %v329_v6 = vmul.f32 0.025076343, %v166_v63  ;;  %v2069_v7 = vadd.f32 %v382_v27, %v377_v32  ;;  %v324_v34 = vadd.f32 %v1950_v39, %v2030_v56 }
 0x10c   : > { %v215_v13 = vadd.f32 %v210_v33, %v205_v19  ;;  %v273_v11 = vadd.f32 %v268_v16, %v263_v2  ;;  %v374_v38 = vadd.f32 %v1953_v40, %v2032_v9  ;;  %v379_v35 = vmul.f32 0.00394125, %v166_v63 }
 0x10d   : > { %v435_v22 = vadd.f32 %v1956_v41, %v2034_v20  ;;  %v440_v12 = vmul.f32 0.11688566, %v166_v63  ;;  %v334_v4 = vadd.f32 %v329_v6, %v324_v34  ;;  %v220_v36 = vmul.f32 0.027955486, %v176_v47 }
 0x10e   : > { %v278_v62 = vmul.f32 -0.13159418, %v176_v47  ;;  %v339_v10 = vmul.f32 0.15968552, %v176_v47  ;;  %v384_v15 = vadd.f32 %v379_v35, %v374_v38  ;;  %v389_v19 = vmul.f32 -0.18893914, %v176_v47  ;;  %v184_v63 = vpop.permute.xlu1 %183 }
 0x10f   : > { %v445_v3 = vadd.f32 %v440_v12, %v435_v22  ;;  %v450_v2 = vmul.f32 0.020896768, %v176_v47  ;;  %v2078_v39 = vadd.f32 %v443_v31, %v438_v37  ;;  %v2080_v56 = vadd.f32 %v220_v36, %v215_v13 }
 0x110   : > { %v2082_v9 = vadd.f32 %v278_v62, %v273_v11  ;;  %v209_v40 = vadd.f32 %v1962_v42, %v2038_v23  ;;  %v2087_v41 = vadd.f32 %v339_v10, %v334_v4  ;;  %v2089_v20 = vadd.f32 %v389_v19, %v384_v15 }
 0x111   : > { %v2091_v24 = vadd.f32 %v450_v2, %v445_v3  ;;  %v267_v55 = vadd.f32 %v1965_v43, %v2040_v25  ;;  %v230_v8 = vrot.slane %v2080_v56, 6  ;;  %v328_v0 = vadd.f32 %v1968_v44, %v2042_v26  ;;  %v182_v26 = vpop.permute.xlu0 %181 }
 0x112   : > { %v378_v42 = vadd.f32 %v1971_v45, %v2044_v28  ;;  %v214_v23 = vmul.f32 -0.012532616, %v174_v14  ;;  %v288_v27 = vrot.slane %v2082_v9, 7  ;;  %v399_v32 = vrot.slane %v2089_v20, 1 }
 0x113   : > { %v439_v33 = vadd.f32 %v1974_v46, %v2046_v30  ;;  %v272_v43 = vmul.f32 0.098706625, %v174_v14  ;;  %v383_v16 = vmul.f32 0.00394125, %v174_v14  ;;  %v444_v37 = vmul.f32 0.11688566, %v174_v14 }
 0x114   : > { %v219_v25 = vadd.f32 %v214_v23, %v209_v40  ;;  %v224_v44 = vmul.f32 0.027955486, %v184_v63  ;;  %v460_v45 = vrot.slane %v2091_v24, 2  ;;  %v333_v31 = vmul.f32 0.025076343, %v174_v14 }
 0x115   : > { %v277_v28 = vadd.f32 %v272_v43, %v267_v55  ;;  %v282_v6 = vmul.f32 -0.13159418, %v184_v63  ;;  %v388_v47 = vadd.f32 %v383_v16, %v378_v42  ;;  %v343_v11 = vmul.f32 0.15968552, %v184_v63  ;;  %v160_v55 = vpop.permute.xlu1 %159  ;;  %v150_v23 = vpop.permute.xlu0 %149 }
 0x116   : > { %v229_v13 = vadd.f32 %v224_v44, %v219_v25  ;;  %v393_v34 = vmul.f32 -0.18893914, %v184_v63  ;;  %v449_v38 = vadd.f32 %v444_v37, %v439_v33  ;;  %v454_v46 = vmul.f32 0.020896768, %v184_v63 }
 0x117   : > { %v287_v35 = vadd.f32 %v282_v6, %v277_v28  ;;  %v223_v30 = vmul.f32 0.027955486, %v182_v26  ;;  %v281_v4 = vmul.f32 -0.13159418, %v182_v26  ;;  %v342_v36 = vmul.f32 0.15968552, %v182_v26 }
 0x118   : > { %v234_v22 = vrot.slane %v229_v13, 6  ;;  %v2107_v12 = vadd.f32 %v393_v34, %v388_v47  ;;  %v2109_v10 = vadd.f32 %v454_v46, %v449_v38  ;;  %v392_v14 = vmul.f32 -0.18893914, %v182_v26 }
 0x119   : > { %v292_v62 = vrot.slane %v287_v35, 7  ;;  %v2112_v15 = vadd.f32 %v223_v30, %v2060_v29  ;;  %v338_v3 = vadd.f32 %v333_v31, %v328_v0  ;;  %v2120_v40 = vadd.f32 %v281_v4, %v2063_v54 }
 0x11a   : > { %v242_v19 = vsel %vm237_vm1, %v234_v22, %v230_v8  ;;  %v403_v2 = vrot.slane %v2107_v12, 1  ;;  %v2646_v29 = vrot.slane %v2109_v10, 2  ;;  %v2129_v42 = vadd.f32 %v392_v14, %v2069_v7 }
 0x11b   : > { %v298_v63 = vsel %vm293_vm2, %v292_v62, %v288_v27  ;;  %v233_v0 = vrot.slane %v2112_v15, 6  ;;  %v348_v33 = vadd.f32 %v343_v11, %v338_v3  ;;  %v291_v43 = vrot.slane %v2120_v40, 7  ;;  %v2679_v15 = vld [vmem:[#allocation37_spill] sm:$0xff] }
 0x11c   : > { %v2133_v54 = vadd.f32 %v342_v36, %v2066_v1  ;;  %v453_v25 = vmul.f32 0.020896768, %v182_v26  ;;  %v2135_v16 = vadd.f32 %v298_v63, %v242_v19  ;;  %v409_v37 = vsel %vm404_vm3, %v403_v2, %v399_v32 }
 0x11d   : > { %v238_v7 = vsel %vm237_vm1, %v233_v0, %v234_v22  ;;  %v192_v44 = vmul.f32 0.19143195, %v160_v55  ;;  %v470_v1 = vsel %vm465_vm4, %v2646_v29, %v460_v45  ;;  %v294_v26 = vsel %vm293_vm2, %v291_v43, %v292_v62  ;;  %v168_v62 = vpop.permute.xlu0 %167 }
 0x11e   : > { %v250_v28 = vmul.f32 -0.075922154, %v160_v55  ;;  %v311_v31 = vmul.f32 -0.18988696, %v160_v55  ;;  %v303_v6 = vadd.f32 %v294_v26, %v238_v7  ;;  %v402_v47 = vrot.slane %v2129_v42, 1  ;;  %v178_v7 = vpop.permute.xlu1 %177 }
 0x11f   : > { %v361_v13 = vmul.f32 0.13365607, %v160_v55  ;;  %v187_v11 = vmul.f32 0.1790668, %v150_v23  ;;  %v2159_v34 = vadd.f32 %v453_v25, %v2078_v39  ;;  %v422_v38 = vmul.f32 0.18320751, %v160_v55 }
 0x120   : > { %v245_v35 = vmul.f32 -0.1337988, %v150_v23  ;;  %v306_v46 = vmul.f32 0.19414154, %v150_v23  ;;  %v353_v30 = vadd.f32 %v348_v33, %v303_v6  ;;  %v356_v4 = vmul.f32 0.17381501, %v150_v23 }
 0x121   : > { %v197_v22 = vadd.f32 %v192_v44, %v187_v11  ;;  %v206_v36 = vadd.f32 %v1977_v48, %v2048_v57  ;;  %v417_v19 = vmul.f32 -0.1874045, %v150_v23  ;;  %v264_v63 = vadd.f32 %v1980_v49, %v2052_v17  ;;  %v486_v49 = vld [vmem:[#allocation8 + $0x20] sm:$0xff] }
 0x122   : > { %v255_v14 = vadd.f32 %v250_v28, %v245_v35  ;;  %v316_v3 = vadd.f32 %v311_v31, %v306_v46  ;;  %v414_v26 = vadd.f32 %v409_v37, %v353_v30  ;;  %v366_v39 = vadd.f32 %v361_v13, %v356_v4 }
 0x123   : > { %v325_v55 = vadd.f32 %v1983_v50, %v2054_v18  ;;  %v375_v33 = vadd.f32 %v1986_v51, %v2056_v5  ;;  %v436_v25 = vadd.f32 %v1989_v52, %v2058_v21  ;;  %v211_v48 = vmul.f32 -0.012532616, %v168_v62  ;;  %v170_v21 = vpop.permute.xlu0 %169 }
 0x124   : > { %v269_v57 = vmul.f32 0.098706625, %v168_v62  ;;  %v330_v44 = vmul.f32 0.025076343, %v168_v62  ;;  %v475_v28 = vadd.f32 %v470_v1, %v414_v26  ;;  %v380_v23 = vmul.f32 0.00394125, %v168_v62 }
 0x125   : > { %v441_v31 = vmul.f32 0.11688566, %v168_v62  ;;  %v221_v6 = vmul.f32 0.027955486, %v178_v7  ;;  %v216_v17 = vadd.f32 %v211_v48, %v206_v36  ;;  %v279_v11 = vmul.f32 -0.13159418, %v178_v7  ;;  %v180_v48 = vpop.permute.xlu1 %179 }
 0x126   : > { %v274_v37 = vadd.f32 %v269_v57, %v264_v63  ;;  %v335_v13 = vadd.f32 %v330_v44, %v325_v55  ;;  %v427_v35 = vadd.f32 %v422_v38, %v417_v19  ;;  %v385_v50 = vadd.f32 %v380_v23, %v375_v33 }
 0x127   : > { %v446_v18 = vadd.f32 %v441_v31, %v436_v25  ;;  %v340_v46 = vmul.f32 0.15968552, %v178_v7  ;;  %v226_v51 = vadd.f32 %v221_v6, %v216_v17  ;;  %v390_v30 = vmul.f32 -0.18893914, %v178_v7 }
 0x128   : > { %v284_v5 = vadd.f32 %v279_v11, %v274_v37  ;;  %v451_v52 = vmul.f32 0.020896768, %v178_v7  ;;  %v491_v4 = vmul.f32 %v486_v49, %v475_v28  ;;  %v207_v1 = vadd.f32 %v1992_v53, %v197_v22 }
 0x129   : > { %v345_v29 = vadd.f32 %v340_v46, %v335_v13  ;;  %v265_v62 = vadd.f32 %v1997_v58, %v255_v14  ;;  %v231_v26 = vrot.slane %v226_v51, 6  ;;  %v395_v63 = vadd.f32 %v390_v30, %v385_v50 }
 0x12a   : > { %v289_v36 = vrot.slane %v284_v5, 7  ;;  %v2173_v55 = vadd.f32 %v451_v52, %v446_v18  ;;  %v326_v38 = vadd.f32 %v2000_v59, %v316_v3  ;;  %v376_v19 = vadd.f32 %v2003_v60, %v366_v39  ;;  %v2677_v39 = vld [vmem:[#allocation31_spill] sm:$0xff] }
 0x12b   : > { %v212_v33 = vmul.f32 -0.012532616, %v170_v21  ;;  %v270_v25 = vmul.f32 0.098706625, %v170_v21  ;;  %v241_v7 = vsel %vm237_vm1, %v230_v8, %v231_v26  ;;  %v400_v58 = vrot.slane %v395_v63, 1 }
 0x12c   : > { %v297_v53 = vsel %vm293_vm2, %v288_v27, %v289_v36  ;;  %v461_v22 = vrot.slane %v2173_v55, 2  ;;  %v331_v60 = vmul.f32 0.025076343, %v170_v21  ;;  %v437_v57 = vadd.f32 %v2677_v39, %v427_v35  ;;  %v2233_v39 = vld [vmem:[#allocation9 + $0x10] sm:$0xff] }
 0x12d   : > { %v300_v14 = vadd.f32 %v297_v53, %v241_v7  ;;  %v217_v59 = vadd.f32 %v212_v33, %v207_v1  ;;  %v275_v3 = vadd.f32 %v270_v25, %v265_v62  ;;  %v381_v44 = vmul.f32 0.00394125, %v170_v21  ;;  %v2206_v62 = vld [vmem:[#allocation12] sm:$0xff]  ;;  %v2680_v33 = vld [vmem:[#allocation35_spill] sm:$0xff] }
 0x12e   : > { %v442_v28 = vmul.f32 0.11688566, %v170_v21  ;;  %v222_v56 = vmul.f32 0.027955486, %v180_v48  ;;  %v336_v23 = vadd.f32 %v331_v60, %v326_v38  ;;  %v280_v31 = vmul.f32 -0.13159418, %v180_v48 }
 0x12f   : > { %v341_v8 = vmul.f32 0.15968552, %v180_v48  ;;  %v349_v9 = vadd.f32 %v2087_v41, %v2135_v16  ;;  %v386_v6 = vadd.f32 %v381_v44, %v376_v19  ;;  %v391_v17 = vmul.f32 -0.18893914, %v180_v48  ;;  %v2197_v16 = vld [vmem:[#allocation8] sm:$0xff]  ;;  %v2218_v19 = vld [vmem:[#allocation9 + $0x8] sm:$0xff] }
 0x130   : > { %v447_v27 = vadd.f32 %v442_v28, %v437_v57  ;;  %v227_v49 = vadd.f32 %v222_v56, %v217_v59  ;;  %v350_v37 = vadd.f32 %v345_v29, %v300_v14  ;;  %v285_v13 = vadd.f32 %v280_v31, %v275_v3  ;;  %v2678_v29 = vld [vmem:[#allocation34_spill] sm:$0xff]  ;;  %v478_v7 = vld [vmem:[#allocation3 + $0x8] sm:$0xff]  ;;  %v2684_v59 = vld [vmem:[#allocation33_spill] sm:$0xff] }
 0x131   : > { %v452_v11 = vmul.f32 0.020896768, %v180_v48  ;;  %v408_v35 = vsel %vm404_vm3, %v399_v32, %v400_v58  ;;  %v346_v18 = vadd.f32 %v341_v8, %v336_v23  ;;  %v396_v46 = vadd.f32 %v391_v17, %v386_v6  ;;  %v2681_v25 = vld [vmem:[#allocation38_spill] sm:$0xff]  ;;  %v2231_v60 = vld [vmem:[#allocation8 + $0x8] sm:$0xff]  ;;  %v2241_v56 = vld [vmem:[#allocation12 + $0x8] sm:$0xff] }
 0x132   : > { %v232_v50 = vrot.slane %v227_v49, 6  ;;  %v410_v51 = vadd.f32 %v408_v35, %v349_v9  ;;  %v290_v5 = vrot.slane %v285_v13, 7  ;;  %v469_v41 = vsel %vm465_vm4, %v460_v45, %v461_v22  ;;  %v2226_v53 = vld [vmem:[#allocation11 + $0x8] sm:$0xff]  ;;  %2685 = vst [vmem:[#allocation37_spill] sm:$0xff] %v2231_v60  ;;  %v2686_v44 = vld [vmem:[#allocation28_spill] sm:$0xff]  ;;  %2687 = vst [vmem:[#allocation35_spill] sm:$0xff] %v2241_v56 }
 0x133   : > { %v457_v30 = vadd.f32 %v452_v11, %v447_v27  ;;  %v506_v52 = vadd.f32 %v2678_v29, %v491_v4  ;;  %v401_v21 = vrot.slane %v396_v46, 1  ;;  %v463_v40 = vrot.slane %v2159_v34, 2  ;;  %2683 = vst [vmem:[#allocation34_spill] sm:$0xff] %v2226_v53  ;;  %v2253_v23 = vld [vmem:[#allocation9 + $0x18] sm:$0xff]  ;;  %v2688_v31 = vld [vmem:[#allocation36_spill] sm:$0xff]  ;;  %v2257_v49 = vld [vmem:[#allocation8 + $0x10] sm:$0xff] }
 0x134   : > { %v239_v20 = vsel %vm237_vm1, %v232_v50, %v233_v0  ;;  %v240_v32 = vsel %vm237_vm1, %v231_v26, %v232_v50  ;;  %v471_v1 = vadd.f32 %v469_v41, %v410_v51  ;;  %v295_v24 = vsel %vm293_vm2, %v290_v5, %v291_v43  ;;  %v479_v27 = vld [vmem:[#allocation3 + $0x10] sm:$0xff]  ;;  %2689 = vst [vmem:[#allocation38_spill] sm:$0xff] %v2257_v49  ;;  %v2259_v17 = vld [vmem:[#allocation11 + $0x10] sm:$0xff]  ;;  %v2691_v13 = vld [vmem:[#allocation29_spill] sm:$0xff] }
 0x135   : > { %v296_v45 = vsel %vm293_vm2, %v289_v36, %v290_v5  ;;  %v462_v4 = vrot.slane %v457_v30, 2  ;;  %v521_v63 = vsub.f32 %v506_v52, %v2679_v15  ;;  %v302_v0 = vadd.f32 %v295_v24, %v239_v20  ;;  %2690 = vst [vmem:[#allocation33_spill] sm:$0xff] %v2259_v17  ;;  %v480_v35 = vld [vmem:[#allocation3 + $0x18] sm:$0xff]  ;;  %v2270_v50 = vld [vmem:[#allocation8 + $0x18] sm:$0xff]  ;;  %v2695_v30 = vld [vmem:[#allocation27_spill] sm:$0xff] }
 0x136   : > { %v301_v55 = vadd.f32 %v296_v45, %v240_v32  ;;  %v487_v38 = vmul.f32 %v2197_v16, %v471_v1  ;;  %v407_v26 = vsel %vm404_vm3, %v400_v58, %v401_v21  ;;  %v528_v43 = vmul.f32 %v2680_v33, %v2206_v62  ;;  %2693 = vst [vmem:[#allocation28_spill] sm:$0xff] %v2270_v50  ;;  %v2283_v20 = vld [vmem:[#allocation12 + $0x10] sm:$0xff]  ;;  %v2285_v32 = vld [vmem:[#allocation12 + $0x18] sm:$0xff] }
 0x137   : > { %v2224_v48 = vadd.f32 %v2681_v25, %v521_v63  ;;  %v411_v36 = vadd.f32 %v407_v26, %v350_v37  ;;  %v468_v58 = vsel %vm465_vm4, %v461_v22, %v462_v4  ;;  %v352_v34 = vadd.f32 %v2133_v54, %v302_v0  ;;  %2696 = vst [vmem:[#allocation29_spill] sm:$0xff] %v2283_v20 }
 0x138   : > { %v351_v14 = vadd.f32 %v346_v18, %v301_v55  ;;  %v502_v3 = vadd.f32 %v2684_v59, %v487_v38  ;;  %v498_v28 = vmul.f32 %v2218_v19, %v2686_v44  ;;  %v406_v22 = vsel %vm404_vm3, %v401_v21, %v402_v47  ;;  %v2272_v18 = vld [vmem:[#allocation11 + $0x18] sm:$0xff]  ;;  %2697 = vst [vmem:[#allocation27_spill] sm:$0xff] %v2285_v32 }
 0x139   : > { %2682 = vst [vmem:[#allocation31_spill] sm:$0xff] %v2224_v48  ;;  %542 = vst [vmem:[#allocation3 + $0x20] sm:$0xff] %v2224_v48  ;;  %685 = vrot.lane.b32.xlu1 %v2224_v48, %s1687_s1  ;;  %v472_v57 = vadd.f32 %v468_v58, %v411_v36  ;;  %v405_v54 = vsel %vm404_vm3, %v402_v47, %v403_v2  ;;  %v513_v9 = vmul.f32 %v2226_v53, %v478_v7  ;;  %v2698_v45 = vmov 0.0  }
 0x13a   : > { %v517_v8 = vsub.f32 %v502_v3, %v2688_v31  ;;  %v412_v6 = vadd.f32 %v406_v22, %v351_v14  ;;  %v413_v37 = vadd.f32 %v405_v54, %v352_v34  ;;  %v467_v42 = vsel %vm465_vm4, %v462_v4, %v463_v40  ;;  %2694 = vst [vmem:[#allocation36_spill] sm:$0xff] %v2272_v18 }
 0x13b   : > { %v488_v12 = vmul.f32 %v2231_v60, %v472_v57  ;;  %v499_v2 = vmul.f32 %v2233_v39, %v2691_v13  ;;  %v2692_v47 = vrot.slane %v2109_v10, 2  ;;  %v500_v41 = vmul.f32 %v2253_v23, %v2695_v30 }
 0x13c   : > { %v2274_v46 = vadd.f32 %v528_v43, %v517_v8  ;;  %v473_v51 = vadd.f32 %v467_v42, %v412_v6  ;;  %v529_v52 = vmul.f32 %v2680_v33, %v2241_v56  ;;  %v514_v10 = vmul.f32 %v2259_v17, %v479_v27 }
 0x13d   : > { %v466_v11 = vsel %vm465_vm4, %v463_v40, %v2692_v47  ;;  %v503_v29 = vadd.f32 %v498_v28, %v488_v12  ;;  %695 = vrot.lane.b32.xlu1 %v2224_v48, %s1688_s20  ;;  %v515_v24 = vmul.f32 %v2272_v18, %v480_v35  ;;  %v530_v63 = vmul.f32 %v2680_v33, %v2283_v20 }
 0x13e   : > { %v474_v5 = vadd.f32 %v466_v11, %v413_v37  ;;  %538 = vst [vmem:[#allocation3] sm:$0xff] %v2274_v46  ;;  %1332 = vmatmul.mubr.f32.vlgmr.msra.gmra.mrb[0].mxu0 %v2274_v46  ;;  %v489_v21 = vmul.f32 %v2257_v49, %v473_v51  ;;  %677 = vrot.lane.b32.xlu0 %v2274_v46, %s1687_s1  ;;  %v791_v36 = vmul.f32 0.075792216, %v2224_v48  ;;  %v851_v7 = vmul.f32 0.056016732, %v2224_v48  ;;  %v1003_v51 = vld [vmem:[#allocation2] sm:$0xff] }
 0x13f   : > { %1334 = vmatprep.mubr.msk.f32.mxu0 %vm1692_vm0, %v2698_v45  ;;  %v518_v4 = vsub.f32 %v503_v29, %v513_v9  ;;  %v531_v0 = vmul.f32 %v2680_v33, %v2285_v32  ;;  %v736_v33 = vmul.f32 -0.06708341, %v2224_v48  ;;  %v2334_v14 = vmul.f32 0.09024649, %v2224_v48 }
 0x140   : > { %v490_v1 = vmul.f32 %v2270_v50, %v474_v5  ;;  %v504_v15 = vadd.f32 %v499_v2, %v489_v21  ;;  %v2337_v59 = vmul.f32 0.0075276853, %v2224_v48  ;;  %v2340_v3 = vmul.f32 -0.06708341, %v2274_v46  ;;  %v2699_v2 = vld [vmem:[#allocation30_spill] sm:$0xff] }
 0x141   : > { %v534_v38 = vadd.f32 %v529_v52, %v518_v4  ;;  %v2343_v58 = vmul.f32 0.075792216, %v2274_v46  ;;  %v2346_v34 = vmul.f32 0.056016732, %v2274_v46  ;;  %v2349_v57 = vmul.f32 0.09024649, %v2274_v46 }
 0x142   : > { %v505_v55 = vadd.f32 %v500_v41, %v490_v1  ;;  %v519_v26 = vsub.f32 %v504_v15, %v514_v10  ;;  %687 = vrot.lane.b32.xlu0 %v2274_v46, %s1688_s20  ;;  %v2352_v44 = vmul.f32 0.0075276853, %v2274_v46  ;;  %v2378_v47 = vmul.f32 %v2274_v46, %v2699_v2 }
 0x143   : > { %539 = vst [vmem:[#allocation3 + $0x8] sm:$0xff] %v534_v38  ;;  %1335 = vmatmul.mubr.f32.gmra.mrb[2].mxu0 %v534_v38  ;;  %689 = vrot.lane.b32.xlu1 %v534_v38, %s1688_s20  ;;  %v2354_v28 = vmul.f32 -0.06708341, %v534_v38  ;;  %v2356_v22 = vmul.f32 0.075792216, %v534_v38  ;;  %v2385_v5 = vmul.f32 %v534_v38, %v2218_v19  ;;  %v2394_v10 = vstv %s1002_s25 }
 0x144   : > { %v520_v40 = vsub.f32 %v505_v55, %v515_v24  ;;  %1337 = vmatprep.mubr.msk.f32.mxu0 %vm1692_vm0, %v2698_v45  ;;  %v535_v43 = vadd.f32 %v530_v63, %v519_v26  ;;  %v2358_v54 = vmul.f32 0.056016732, %v534_v38  ;;  %v2360_v31 = vmul.f32 0.09024649, %v534_v38  ;;  %2700 = vst [vmem:[#allocation30_spill] sm:$0xff] %v2378_v47  ;;  %2703 = vst [vmem:[#allocation41_spill] sm:$0xff] %v2394_v10 }
 0x145   : > { %v2362_v8 = vmul.f32 0.0075276853, %v534_v38  ;;  %2701 = vst [vmem:[#allocation39_spill] sm:$0xff] %v2385_v5 }
 0x146   : > { %v536_v25 = vadd.f32 %v531_v0, %v520_v40  ;;  %540 = vst [vmem:[#allocation3 + $0x10] sm:$0xff] %v535_v43  ;;  %679 = vrot.lane.b32.xlu0 %v534_v38, %s1687_s1  ;;  %v2364_v6 = vmul.f32 -0.06708341, %v535_v43  ;;  %v2366_v27 = vmul.f32 0.075792216, %v535_v43  ;;  %v2388_v30 = vmul.f32 %v535_v43, %v2233_v39  ;;  %v2705_v39 = vld [vmem:[#allocation32_spill] sm:$0xff] }
 0x147   : > { %1338 = vmatmul.mubr.f32.gmra.mrb[4].mxu0 %v535_v43  ;;  %705 = vrot.lane.b32.xlu1 %v2224_v48, %s1689_s4  ;;  %v2368_v37 = vmul.f32 0.056016732, %v535_v43  ;;  %v2370_v12 = vmul.f32 0.09024649, %v535_v43  ;;  %v2372_v42 = vmul.f32 0.0075276853, %v535_v43  ;;  %v2400_v0 = vmul.f32 %v1003_v51, %v2705_v39 }
 0x148   : > { %541 = vst [vmem:[#allocation3 + $0x18] sm:$0xff] %v536_v25  ;;  %1340 = vmatprep.mubr.msk.f32.mxu0 %vm1692_vm0, %v2698_v45  ;;  %v2374_v13 = vmul.f32 -0.06708341, %v536_v25  ;;  %v2380_v11 = vmul.f32 0.075792216, %v536_v25  ;;  %2702 = vst [vmem:[#allocation40_spill] sm:$0xff] %v2388_v30  ;;  %v2397_v4 = vmul.f32 %v536_v25, %v2253_v23 }
 0x149   : > { %v2382_v35 = vmul.f32 0.056016732, %v536_v25  ;;  %v2390_v29 = vmul.f32 0.09024649, %v536_v25  ;;  %v2392_v52 = vmul.f32 0.0075276853, %v536_v25 }
 0x14a   : > { %697 = vrot.lane.b32.xlu0 %v2274_v46, %s1689_s4  ;;  %2704 = vst [vmem:[#allocation42_spill] sm:$0xff] %v2397_v4  ;;  %2706 = vst [vmem:[#allocation32_spill] sm:$0xff] %v2400_v0 }
 0x14b   : > { %1341 = vmatmul.mubr.f32.gmra.mrb[6].mxu0 %v536_v25  ;;  %715 = vrot.lane.b32.xlu1 %v2224_v48, %s1690_s30 }
 0x14c   : > { %1343 = vmatprep.mubr.msk.f32.mxu0 %vm1692_vm0, %v2698_v45 }
 0x14e   : > { %707 = vrot.lane.b32.xlu0 %v2274_v46, %s1690_s30 }
 0x14f   : > { %1344 = vmatmul.mubr.f32.gmra.mrb[8].mxu0 %v2224_v48  ;;  %691 = vrot.lane.b32.xlu1 %v535_v43, %s1688_s20 }
 0x152   : > { %681 = vrot.lane.b32.xlu0 %v535_v43, %s1687_s1 }
 0x153   : > { %709 = vrot.lane.b32.xlu1 %v534_v38, %s1690_s30 }
 0x156   : > { %699 = vrot.lane.b32.xlu0 %v534_v38, %s1689_s4 }
 0x157   : > { %693 = vrot.lane.b32.xlu1 %v536_v25, %s1688_s20 }
 0x15a   : > { %683 = vrot.lane.b32.xlu0 %v536_v25, %s1687_s1 }
 0x15b   : > { %711 = vrot.lane.b32.xlu1 %v535_v43, %s1690_s30 }
 0x15e   : > { %701 = vrot.lane.b32.xlu0 %v535_v43, %s1689_s4  ;;  %v2404_v43 = vmul.f32 %v2394_v10, %v2206_v62 }
 0x15f   : > { %713 = vrot.lane.b32.xlu1 %v536_v25, %s1690_s30 }
 0x160   : > { %2707 = vst [vmem:[#allocation43_spill] sm:$0xff] %v2404_v43 }
 0x162   : > { %703 = vrot.lane.b32.xlu0 %v536_v25, %s1689_s4 }
 0x1ab   : > { %v686_v9 = vpop.permute.xlu1 %685 }
 0x1ac   : > { %v721_v41 = vmul.f32 0.1790668, %v686_v9  ;;  %v776_v46 = vmul.f32 -0.1337988, %v686_v9  ;;  %v836_v21 = vmul.f32 0.19414154, %v686_v9 }
 0x1ad   : > { %v886_v1 = vmul.f32 0.17381501, %v686_v9  ;;  %v946_v38 = vmul.f32 -0.1874045, %v686_v9 }
 0x1af   : > { %v696_v24 = vpop.permute.xlu1 %695 }
 0x1b0   : > { %v726_v15 = vmul.f32 0.19143195, %v696_v24  ;;  %v781_v19 = vmul.f32 -0.075922154, %v696_v24  ;;  %v841_v63 = vmul.f32 -0.18988696, %v696_v24  ;;  %v678_v55 = vpop.permute.xlu0 %677 }
 0x1b1   : > { %v891_v26 = vmul.f32 0.13365607, %v696_v24  ;;  %v951_v40 = vmul.f32 0.18320751, %v696_v24  ;;  %v717_v48 = vmul.f32 0.1790668, %v678_v55 }
 0x1b2   : > { %v731_v2 = vadd.f32 %v726_v15, %v721_v41  ;;  %v786_v45 = vadd.f32 %v781_v19, %v776_v46  ;;  %v846_v32 = vadd.f32 %v841_v63, %v836_v21  ;;  %v772_v4 = vmul.f32 -0.1337988, %v678_v55 }
 0x1b3   : > { %v896_v23 = vadd.f32 %v891_v26, %v886_v1  ;;  %v956_v25 = vadd.f32 %v951_v40, %v946_v38  ;;  %v832_v18 = vmul.f32 0.19414154, %v678_v55  ;;  %v882_v50 = vmul.f32 0.17381501, %v678_v55 }
 0x1b4   : > { %v942_v30 = vmul.f32 -0.1874045, %v678_v55  ;;  %v688_v20 = vpop.permute.xlu0 %687  ;;  %v741_v51 = vadd.f32 %v736_v33, %v731_v2  ;;  %v796_v39 = vadd.f32 %v791_v36, %v786_v45  ;;  %v856_v17 = vadd.f32 %v851_v7, %v846_v32 }
 0x1b5   : > { %v690_v9 = vpop.permute.xlu1 %689  ;;  %v722_v56 = vmul.f32 0.19143195, %v688_v20  ;;  %v777_v24 = vmul.f32 -0.075922154, %v688_v20  ;;  %v837_v5 = vmul.f32 -0.18988696, %v688_v20  ;;  %v906_v46 = vadd.f32 %v2334_v14, %v896_v23 }
 0x1b6   : > { %v723_v62 = vmul.f32 0.19143195, %v690_v9  ;;  %v778_v43 = vmul.f32 -0.075922154, %v690_v9  ;;  %v838_v41 = vmul.f32 -0.18988696, %v690_v9  ;;  %v966_v19 = vadd.f32 %v2337_v59, %v956_v25 }
 0x1b7   : > { %v888_v21 = vmul.f32 0.13365607, %v690_v9  ;;  %v948_v1 = vmul.f32 0.18320751, %v690_v9  ;;  %v727_v15 = vadd.f32 %v722_v56, %v717_v48  ;;  %v782_v63 = vadd.f32 %v777_v24, %v772_v4 }
 0x1b8   : > { %v842_v55 = vadd.f32 %v837_v5, %v832_v18  ;;  %v887_v38 = vmul.f32 0.13365607, %v688_v20  ;;  %v947_v33 = vmul.f32 0.18320751, %v688_v20  ;;  %v680_v45 = vpop.permute.xlu0 %679 }
 0x1b9   : > { %v706_v36 = vpop.permute.xlu1 %705  ;;  %v718_v26 = vmul.f32 0.1790668, %v680_v45  ;;  %v773_v40 = vmul.f32 -0.1337988, %v680_v45  ;;  %v833_v2 = vmul.f32 0.19414154, %v680_v45  ;;  %v737_v32 = vadd.f32 %v2340_v3, %v727_v15 }
 0x1ba   : > { %v892_v7 = vadd.f32 %v887_v38, %v882_v50  ;;  %v952_v10 = vadd.f32 %v947_v33, %v942_v30  ;;  %v746_v49 = vmul.f32 -0.012532616, %v706_v36  ;;  %v801_v14 = vmul.f32 0.098706625, %v706_v36 }
 0x1bb   : > { %v861_v23 = vmul.f32 0.025076343, %v706_v36  ;;  %v911_v9 = vmul.f32 0.00394125, %v706_v36  ;;  %v971_v48 = vmul.f32 0.11688566, %v706_v36  ;;  %v728_v56 = vadd.f32 %v723_v62, %v718_v26 }
 0x1bc   : > { %v751_v59 = vadd.f32 %v746_v49, %v741_v51  ;;  %v806_v4 = vadd.f32 %v801_v14, %v796_v39  ;;  %v783_v18 = vadd.f32 %v778_v43, %v773_v40  ;;  %v2409_v5 = vadd.f32 %v838_v41, %v833_v2  ;;  %v698_v20 = vpop.permute.xlu0 %697 }
 0x1bd   : > { %v866_v25 = vadd.f32 %v861_v23, %v856_v17  ;;  %v916_v24 = vadd.f32 %v911_v9, %v906_v46  ;;  %v976_v0 = vadd.f32 %v971_v48, %v966_v19  ;;  %v883_v53 = vmul.f32 0.17381501, %v680_v45  ;;  %v716_v60 = vpop.permute.xlu1 %715 }
 0x1be   : > { %v943_v3 = vmul.f32 -0.1874045, %v680_v45  ;;  %v756_v50 = vmul.f32 0.027955486, %v716_v60  ;;  %v811_v30 = vmul.f32 -0.13159418, %v716_v60  ;;  %v792_v15 = vadd.f32 %v2343_v58, %v782_v63 }
 0x1bf   : > { %v2412_v38 = vadd.f32 %v888_v21, %v883_v53  ;;  %v871_v33 = vmul.f32 0.15968552, %v716_v60  ;;  %v921_v62 = vmul.f32 -0.18893914, %v716_v60  ;;  %v981_v49 = vmul.f32 0.020896768, %v716_v60 }
 0x1c0   : > { %v2414_v51 = vadd.f32 %v948_v1, %v943_v3  ;;  %v2416_v43 = vadd.f32 %v756_v50, %v751_v59  ;;  %v2418_v39 = vadd.f32 %v811_v30, %v806_v4  ;;  %v742_v17 = vmul.f32 -0.012532616, %v698_v20  ;;  %v708_v41 = vpop.permute.xlu0 %707 }
 0x1c1   : > { %v2420_v46 = vadd.f32 %v871_v33, %v866_v25  ;;  %v2422_v19 = vadd.f32 %v921_v62, %v916_v24  ;;  %v2424_v45 = vadd.f32 %v981_v49, %v976_v0  ;;  %v797_v58 = vmul.f32 0.098706625, %v698_v20  ;;  %v692_v53 = vpop.permute.xlu1 %691 }
 0x1c2   : > { %v2660_v21 = vrot.slane %v2416_v43, 6  ;;  %v2663_v60 = vrot.slane %v2418_v39, 7  ;;  %v747_v1 = vadd.f32 %v742_v17, %v737_v32  ;;  %v852_v63 = vadd.f32 %v2346_v34, %v842_v55 }
 0x1c3   : > { %2708 = vst [vmem:[#allocation44_spill] sm:$0xff] %v2420_v46  ;;  %2709 = vst [vmem:[#allocation45_spill] sm:$0xff] %v2424_v45  ;;  %v802_v40 = vadd.f32 %v797_v58, %v792_v15  ;;  %v857_v2 = vmul.f32 0.025076343, %v698_v20  ;;  %v902_v14 = vadd.f32 %v2349_v57, %v892_v7  ;;  %v907_v23 = vmul.f32 0.00394125, %v698_v20 }
 0x1c4   : > { %v962_v0 = vadd.f32 %v2352_v44, %v952_v10  ;;  %v967_v9 = vmul.f32 0.11688566, %v698_v20  ;;  %v724_v59 = vmul.f32 0.19143195, %v692_v53  ;;  %v779_v4 = vmul.f32 -0.075922154, %v692_v53  ;;  %v682_v50 = vpop.permute.xlu0 %681 }
 0x1c5   : > { %v862_v48 = vadd.f32 %v857_v2, %v852_v63  ;;  %v839_v25 = vmul.f32 -0.18988696, %v692_v53  ;;  %v710_v24 = vpop.permute.xlu1 %709  ;;  %v912_v32 = vadd.f32 %v907_v23, %v902_v14  ;;  %v889_v34 = vmul.f32 0.13365607, %v692_v53 }
 0x1c6   : > { %v972_v3 = vadd.f32 %v967_v9, %v962_v0  ;;  %v949_v55 = vmul.f32 0.18320751, %v692_v53  ;;  %v752_v30 = vmul.f32 0.027955486, %v708_v41  ;;  %v807_v33 = vmul.f32 -0.13159418, %v708_v41 }
 0x1c7   : > { %v867_v15 = vmul.f32 0.15968552, %v708_v41  ;;  %v738_v62 = vadd.f32 %v2354_v28, %v728_v56  ;;  %v917_v57 = vmul.f32 -0.18893914, %v708_v41  ;;  %v977_v7 = vmul.f32 0.020896768, %v708_v41 }
 0x1c8   : > { %v753_v49 = vmul.f32 0.027955486, %v710_v24  ;;  %v793_v44 = vadd.f32 %v2356_v22, %v783_v18  ;;  %v2435_v10 = vadd.f32 %v752_v30, %v747_v1  ;;  %v2437_v20 = vadd.f32 %v807_v33, %v802_v40  ;;  %v700_v9 = vpop.permute.xlu0 %699 }
 0x1c9   : > { %v872_v17 = vadd.f32 %v867_v15, %v862_v48  ;;  %v808_v58 = vmul.f32 -0.13159418, %v710_v24  ;;  %v2439_v63 = vadd.f32 %v917_v57, %v912_v32  ;;  %v2441_v53 = vadd.f32 %v977_v7, %v972_v3  ;;  %v694_v23 = vpop.permute.xlu1 %693 }
 0x1ca   : > { %v868_v2 = vmul.f32 0.15968552, %v710_v24  ;;  %v918_v14 = vmul.f32 -0.18893914, %v710_v24  ;;  %v762_v28 = vrot.slane %v2435_v10, 6  ;;  %v2664_v56 = vrot.slane %v2437_v20, 7 }
 0x1cb   : > { %v978_v41 = vmul.f32 0.020896768, %v710_v24  ;;  %v719_v0 = vmul.f32 0.1790668, %v682_v50  ;;  %v774_v1 = vmul.f32 -0.1337988, %v682_v50  ;;  %v853_v45 = vadd.f32 %v2358_v54, %v2409_v5 }
 0x1cc   : > { %v834_v40 = vmul.f32 0.19414154, %v682_v50  ;;  %v771_v48 = vsel %vm237_vm1, %v2660_v21, %v762_v28  ;;  %v826_v24 = vsel %vm293_vm2, %v2663_v60, %v2664_v56  ;;  %v884_v3 = vmul.f32 0.17381501, %v682_v50 }
 0x1cd   : > { %v729_v32 = vadd.f32 %v724_v59, %v719_v0  ;;  %v827_v30 = vadd.f32 %v826_v24, %v771_v48  ;;  %v784_v33 = vadd.f32 %v779_v4, %v774_v1  ;;  %v944_v57 = vmul.f32 -0.1874045, %v682_v50  ;;  %v712_v46 = vpop.permute.xlu1 %711  ;;  %v684_v1 = vpop.permute.xlu0 %683 }
 0x1ce   : > { %v844_v15 = vadd.f32 %v839_v25, %v834_v40  ;;  %v894_v7 = vadd.f32 %v889_v34, %v884_v3  ;;  %v725_v10 = vmul.f32 0.19143195, %v694_v23  ;;  %v780_v26 = vmul.f32 -0.075922154, %v694_v23 }
 0x1cf   : > { %v840_v36 = vmul.f32 -0.18988696, %v694_v23  ;;  %v2457_v18 = vadd.f32 %v872_v17, %v827_v30  ;;  %v954_v21 = vadd.f32 %v949_v55, %v944_v57  ;;  %v890_v22 = vmul.f32 0.13365607, %v694_v23 }
 0x1d0   : > { %v950_v47 = vmul.f32 0.18320751, %v694_v23  ;;  %v903_v59 = vadd.f32 %v2360_v31, %v2412_v38  ;;  %v963_v4 = vadd.f32 %v2362_v8, %v2414_v51  ;;  %v743_v25 = vmul.f32 -0.012532616, %v700_v9 }
 0x1d1   : > { %v798_v34 = vmul.f32 0.098706625, %v700_v9  ;;  %v858_v50 = vmul.f32 0.025076343, %v700_v9  ;;  %v908_v0 = vmul.f32 0.00394125, %v700_v9  ;;  %v739_v17 = vadd.f32 %v2364_v6, %v729_v32 }
 0x1d2   : > { %v748_v55 = vadd.f32 %v743_v25, %v738_v62  ;;  %v968_v40 = vmul.f32 0.11688566, %v700_v9  ;;  %v754_v23 = vmul.f32 0.027955486, %v712_v46  ;;  %v809_v48 = vmul.f32 -0.13159418, %v712_v46 }
 0x1d3   : > { %v803_v24 = vadd.f32 %v798_v34, %v793_v44  ;;  %v863_v3 = vadd.f32 %v858_v50, %v853_v45  ;;  %v913_v54 = vadd.f32 %v908_v0, %v903_v59  ;;  %v869_v5 = vmul.f32 0.15968552, %v712_v46  ;;  %v714_v45 = vpop.permute.xlu1 %713 }
 0x1d4   : > { %v2466_v30 = vadd.f32 %v753_v49, %v748_v55  ;;  %v973_v31 = vadd.f32 %v968_v40, %v963_v4  ;;  %v919_v38 = vmul.f32 -0.18893914, %v712_v46  ;;  %v979_v8 = vmul.f32 0.020896768, %v712_v46  ;;  %v702_v46 = vpop.permute.xlu0 %701 }
 0x1d5   : > { %v2468_v51 = vadd.f32 %v808_v58, %v803_v24  ;;  %v873_v57 = vadd.f32 %v868_v2, %v863_v3  ;;  %v2470_v60 = vadd.f32 %v918_v14, %v913_v54  ;;  %v720_v56 = vmul.f32 0.1790668, %v684_v1 }
 0x1d6   : > { %v763_v6 = vrot.slane %v2466_v30, 6  ;;  %v2473_v62 = vadd.f32 %v978_v41, %v973_v31  ;;  %v775_v9 = vmul.f32 -0.1337988, %v684_v1  ;;  %v835_v44 = vmul.f32 0.19414154, %v684_v1 }
 0x1d7   : > { %v818_v32 = vrot.slane %v2468_v51, 7  ;;  %v928_v49 = vrot.slane %v2470_v60, 1  ;;  %v730_v59 = vadd.f32 %v725_v10, %v720_v56  ;;  %v885_v4 = vmul.f32 0.17381501, %v684_v1 }
 0x1d8   : > { %v770_v58 = vsel %vm237_vm1, %v762_v28, %v763_v6  ;;  %v988_v2 = vrot.slane %v2473_v62, 2  ;;  %v785_v14 = vadd.f32 %v780_v26, %v775_v9  ;;  %v845_v25 = vadd.f32 %v840_v36, %v835_v44  ;;  %v704_v44 = vpop.permute.xlu0 %703 }
 0x1d9   : > { %v2710_v41 = vrot.slane %v2437_v20, 7  ;;  %v895_v50 = vadd.f32 %v890_v22, %v885_v4  ;;  %v945_v0 = vmul.f32 -0.1874045, %v684_v1  ;;  %v755_v55 = vmul.f32 0.027955486, %v714_v45 }
 0x1da   : > { %v810_v24 = vmul.f32 -0.13159418, %v714_v45  ;;  %v870_v56 = vmul.f32 0.15968552, %v714_v45  ;;  %v920_v10 = vmul.f32 -0.18893914, %v714_v45  ;;  %v794_v28 = vadd.f32 %v2366_v27, %v784_v33 }
 0x1db   : > { %v825_v34 = vsel %vm293_vm2, %v2710_v41, %v818_v32  ;;  %v955_v3 = vadd.f32 %v950_v47, %v945_v0  ;;  %v980_v54 = vmul.f32 0.020896768, %v714_v45  ;;  %v854_v30 = vadd.f32 %v2368_v37, %v844_v15 }
 0x1dc   : > { %v828_v40 = vadd.f32 %v825_v34, %v770_v58  ;;  %v904_v36 = vadd.f32 %v2370_v12, %v894_v7  ;;  %v964_v20 = vadd.f32 %v2372_v42, %v954_v21  ;;  %v744_v31 = vmul.f32 -0.012532616, %v702_v46 }
 0x1dd   : > { %v799_v22 = vmul.f32 0.098706625, %v702_v46  ;;  %v859_v1 = vmul.f32 0.025076343, %v702_v46  ;;  %v909_v51 = vmul.f32 0.00394125, %v702_v46  ;;  %v740_v9 = vadd.f32 %v2374_v13, %v730_v59 }
 0x1de   : > { %v2486_v26 = vadd.f32 %v873_v57, %v828_v40  ;;  %v749_v4 = vadd.f32 %v744_v31, %v739_v17  ;;  %v969_v47 = vmul.f32 0.11688566, %v702_v46  ;;  %v795_v45 = vadd.f32 %v2380_v11, %v785_v14 }
 0x1df   : > { %v855_v27 = vadd.f32 %v2382_v35, %v845_v25  ;;  %v804_v37 = vadd.f32 %v799_v22, %v794_v28  ;;  %v864_v33 = vadd.f32 %v859_v1, %v854_v30  ;;  %v914_v15 = vadd.f32 %v909_v51, %v904_v36 }
 0x1e0   : > { %v905_v12 = vadd.f32 %v2390_v29, %v895_v50  ;;  %v759_v7 = vadd.f32 %v754_v23, %v749_v4  ;;  %v974_v42 = vadd.f32 %v969_v47, %v964_v20  ;;  %v965_v21 = vadd.f32 %v2392_v52, %v955_v3 }
 0x1e1   : > { %v745_v57 = vmul.f32 -0.012532616, %v704_v44  ;;  %v814_v58 = vadd.f32 %v809_v48, %v804_v37  ;;  %v874_v41 = vadd.f32 %v869_v5, %v864_v33  ;;  %v924_v13 = vadd.f32 %v919_v38, %v914_v15 }
 0x1e2   : > { %v800_v59 = vmul.f32 0.098706625, %v704_v44  ;;  %v764_v17 = vrot.slane %v759_v7, 6  ;;  %v984_v46 = vadd.f32 %v979_v8, %v974_v42  ;;  %v860_v11 = vmul.f32 0.025076343, %v704_v44 }
 0x1e3   : > { %v750_v34 = vadd.f32 %v745_v57, %v740_v9  ;;  %v819_v14 = vrot.slane %v814_v58, 7  ;;  %v929_v35 = vrot.slane %v924_v13, 1  ;;  %v910_v0 = vmul.f32 0.00394125, %v704_v44  ;;  %v1005_v58 = vld [vmem:[#allocation2 + $0x10] sm:$0xff] }
 0x1e4   : > { %v805_v25 = vadd.f32 %v800_v59, %v795_v45  ;;  %v769_v29 = vsel %vm237_vm1, %v763_v6, %v764_v17  ;;  %v989_v23 = vrot.slane %v984_v46, 2  ;;  %v865_v40 = vadd.f32 %v860_v11, %v855_v27  ;;  %v2718_v59 = vld [vmem:[#allocation44_spill] sm:$0xff]  ;;  %v2719_v46 = vld [vmem:[#allocation30_spill] sm:$0xff] }
 0x1e5   : > { %v760_v50 = vadd.f32 %v755_v55, %v750_v34  ;;  %v824_v52 = vsel %vm293_vm2, %v818_v32, %v819_v14  ;;  %v915_v5 = vadd.f32 %v910_v0, %v905_v12  ;;  %v970_v38 = vmul.f32 0.11688566, %v704_v44  ;;  %v2723_v0 = vld [vmem:[#allocation34_spill] sm:$0xff] }
 0x1e6   : > { %v815_v48 = vadd.f32 %v810_v24, %v805_v25  ;;  %v829_v3 = vadd.f32 %v824_v52, %v769_v29  ;;  %v875_v28 = vadd.f32 %v870_v56, %v865_v40  ;;  %v2711_v30 = vrot.slane %v2439_v63, 1  ;;  %v2726_v63 = vld [vmem:[#allocation32_spill] sm:$0xff] }
 0x1e7   : > { %v765_v8 = vrot.slane %v760_v50, 6  ;;  %v925_v20 = vadd.f32 %v920_v10, %v915_v5  ;;  %v975_v55 = vadd.f32 %v970_v38, %v965_v21  ;;  %v2712_v32 = vrot.slane %v2416_v43, 6  ;;  %v1022_v5 = vld [vmem:[#allocation9 + $0x20] sm:$0xff] }
 0x1e8   : > { %v935_v36 = vsel %vm404_vm3, %v2711_v30, %v928_v49  ;;  %v820_v6 = vrot.slane %v815_v48, 7  ;;  %v879_v22 = vadd.f32 %v874_v41, %v829_v3  ;;  %v2713_v1 = vrot.slane %v2441_v53, 2  ;;  %v2716_v41 = vld [vmem:[#allocation45_spill] sm:$0xff] }
 0x1e9   : > { %v937_v31 = vadd.f32 %v935_v36, %v2457_v18  ;;  %v767_v24 = vsel %vm237_vm1, %v765_v8, %v2712_v32  ;;  %v768_v56 = vsel %vm237_vm1, %v764_v17, %v765_v8  ;;  %v2714_v10 = vrot.slane %v2418_v39, 7  ;;  %v2728_v8 = vld [vmem:[#allocation33_spill] sm:$0xff] }
 0x1ea   : > { %v995_v51 = vsel %vm465_vm4, %v2713_v1, %v988_v2  ;;  %v823_v43 = vsel %vm293_vm2, %v819_v14, %v820_v6  ;;  %v930_v9 = vrot.slane %v925_v20, 1  ;;  %v985_v44 = vadd.f32 %v980_v54, %v975_v55  ;;  %v1007_v36 = vld [vmem:[#allocation2 + $0x20] sm:$0xff]  ;;  %v2729_v55 = vld [vmem:[#allocation39_spill] sm:$0xff] }
 0x1eb   : > { %v822_v18 = vsel %vm293_vm2, %v820_v6, %v2714_v10  ;;  %v830_v4 = vadd.f32 %v823_v43, %v768_v56  ;;  %v997_v45 = vadd.f32 %v995_v51, %v937_v31  ;;  %v934_v27 = vsel %vm404_vm3, %v928_v49, %v929_v35  ;;  %v1004_v49 = vld [vmem:[#allocation2 + $0x8] sm:$0xff]  ;;  %v1012_v6 = vld [vmem:[#allocation8 + $0x20] sm:$0xff]  ;;  %v1037_v20 = vld [vmem:[#allocation11 + $0x20] sm:$0xff] }
 0x1ec   : > { %v831_v47 = vadd.f32 %v822_v18, %v767_v24  ;;  %v2715_v37 = vrot.slane %v2422_v19, 1  ;;  %v933_v33 = vsel %vm404_vm3, %v929_v35, %v930_v9  ;;  %v990_v15 = vrot.slane %v985_v44, 2  ;;  %v2722_v35 = vld [vmem:[#allocation37_spill] sm:$0xff]  ;;  %v2727_v19 = vld [vmem:[#allocation38_spill] sm:$0xff]  ;;  %v2734_v10 = vld [vmem:[#allocation40_spill] sm:$0xff] }
 0x1ed   : > { %v938_v12 = vadd.f32 %v934_v27, %v2486_v26  ;;  %v880_v54 = vadd.f32 %v875_v28, %v830_v4  ;;  %v1013_v7 = vmul.f32 %v997_v45, %v2197_v16  ;;  %v994_v60 = vsel %vm465_vm4, %v988_v2, %v989_v23  ;;  %v2731_v53 = vld [vmem:[#allocation41_spill] sm:$0xff]  ;;  %v2735_v43 = vld [vmem:[#allocation28_spill] sm:$0xff]  ;;  %v2737_v27 = vld [vmem:[#allocation31_spill] sm:$0xff] }
 0x1ee   : > { %v932_v39 = vsel %vm404_vm3, %v930_v9, %v2715_v37  ;;  %v939_v42 = vadd.f32 %v933_v33, %v879_v22  ;;  %v993_v57 = vsel %vm465_vm4, %v989_v23, %v990_v15  ;;  %v2717_v13 = vrot.slane %v2716_v41, 2  ;;  %v1006_v23 = vld [vmem:[#allocation2 + $0x18] sm:$0xff]  ;;  %v2730_v22 = vld [vmem:[#allocation35_spill] sm:$0xff]  ;;  %v2732_v24 = vld [vmem:[#allocation29_spill] sm:$0xff] }
 0x1ef   : > { %v998_v21 = vadd.f32 %v994_v60, %v938_v12  ;;  %v881_v17 = vadd.f32 %v2718_v59, %v831_v47  ;;  %v940_v16 = vadd.f32 %v932_v39, %v880_v54  ;;  %v1028_v62 = vadd.f32 %v2719_v46, %v1013_v7  ;;  %v2736_v44 = vld [vmem:[#allocation36_spill] sm:$0xff]  ;;  %v2739_v54 = vld [vmem:[#allocation27_spill] sm:$0xff] }
 0x1f0   : > { %v992_v26 = vsel %vm465_vm4, %v990_v15, %v2717_v13  ;;  %v999_v34 = vadd.f32 %v993_v57, %v939_v42  ;;  %v2720_v2 = vmov %v2711_v30  ;;  %v2721_v11 = vmov %v2715_v37  ;;  %v2738_v15 = vld [vmem:[#allocation42_spill] sm:$0xff]  ;;  %v649_v46 = vld [vmem:[#allocation14] sm:$0xff] }
 0x1f1   : > { %v936_v14 = vsel %vm404_vm3, %v2721_v11, %v2720_v2  ;;  %v1014_v25 = vmul.f32 %v998_v21, %v2722_v35  ;;  %v1039_v29 = vmul.f32 %v1004_v49, %v2723_v0  ;;  %v2724_v40 = vmov %v2713_v1  ;;  %v2733_v1 = vld [vmem:[#allocation43_spill] sm:$0xff]  ;;  %v1468_v21 = vld [vmem:[#allocation12 + $0x20] sm:$0xff]  ;;  %v651_v35 = vld [vmem:[#allocation14 + $0x10] sm:$0xff] }
 0x1f2   : > { %v941_v50 = vadd.f32 %v936_v14, %v881_v17  ;;  %v2725_v52 = vmov %v2717_v13  ;;  %v1043_v38 = vsub.f32 %v1028_v62, %v2726_v63  ;;  %v1015_v3 = vmul.f32 %v999_v34, %v2727_v19  ;;  %v650_v62 = vld [vmem:[#allocation14 + $0x8] sm:$0xff]  ;;  %v653_v63 = vld [vmem:[#allocation14 + $0x20] sm:$0xff] }
 0x1f3   : > { %v996_v48 = vsel %vm465_vm4, %v2725_v52, %v2724_v40  ;;  %v1040_v28 = vmul.f32 %v1005_v58, %v2728_v8  ;;  %v1000_v30 = vadd.f32 %v992_v26, %v940_v16  ;;  %v1029_v31 = vadd.f32 %v2729_v55, %v1014_v25 }
 0x1f4   : > { %v1055_v32 = vmul.f32 %v2731_v53, %v2730_v22  ;;  %v1056_v61 = vmul.f32 %v2731_v53, %v2732_v24  ;;  %v1001_v56 = vadd.f32 %v996_v48, %v941_v50  ;;  %v1059_v51 = vadd.f32 %v2733_v1, %v1043_v38  ;;  %v652_v50 = vld [vmem:[#allocation14 + $0x18] sm:$0xff] }
 0x1f5   : > { %v1030_v18 = vadd.f32 %v2734_v10, %v1015_v3  ;;  %v1016_v9 = vmul.f32 %v1000_v30, %v2735_v43  ;;  %v1041_v4 = vmul.f32 %v1006_v23, %v2736_v44  ;;  %v1044_v47 = vsub.f32 %v1029_v31, %v1039_v29 }
 0x1f6   : > { %v1017_v45 = vmul.f32 %v1012_v6, %v1001_v56  ;;  %v1027_v37 = vmul.f32 %v1022_v5, %v2737_v27  ;;  %v1042_v39 = vmul.f32 %v1037_v20, %v1007_v36  ;;  %1064 = vst [vmem:[#allocation2] sm:$0xff] %v1059_v51  ;;  %1379 = vmatmul.mubr.f32.vlgmr.msra.gmra.mrb[0].mxu1 %v1059_v51  ;;  %v2740_v60 = vmov 0.0  }
 0x1f7   : > { %v1045_v33 = vsub.f32 %v1030_v18, %v1040_v28  ;;  %v1031_v12 = vadd.f32 %v2738_v15, %v1016_v9  ;;  %v1057_v7 = vmul.f32 %v2731_v53, %v2739_v54  ;;  %1381 = vmatprep.mubr.msk.f32.mxu1 %vm1692_vm0, %v2740_v60  ;;  %v1060_v49 = vadd.f32 %v1055_v32, %v1044_v47 }
 0x1f8   : > { %v1032_v42 = vadd.f32 %v1027_v37, %v1017_v45  ;;  %v1058_v57 = vmul.f32 %v1468_v21, %v2731_v53 }
 0x1f9   : > { %v1061_v58 = vadd.f32 %v1056_v61, %v1045_v33  ;;  %v1046_v41 = vsub.f32 %v1031_v12, %v1041_v4  ;;  %1065 = vst [vmem:[#allocation2 + $0x8] sm:$0xff] %v1060_v49 }
 0x1fa   : > { %v1047_v13 = vsub.f32 %v1032_v42, %v1042_v39  ;;  %1382 = vmatmul.mubr.f32.gmra.mrb[2].mxu1 %v1060_v49 }
 0x1fb   : > { %1066 = vst [vmem:[#allocation2 + $0x10] sm:$0xff] %v1061_v58  ;;  %v1062_v26 = vadd.f32 %v1057_v7, %v1046_v41  ;;  %1384 = vmatprep.mubr.msk.f32.mxu1 %vm1692_vm0, %v2740_v60 }
 0x1fc   : > { %v1063_v59 = vadd.f32 %v1058_v57, %v1047_v13 }
 0x1fd   : > { %1067 = vst [vmem:[#allocation2 + $0x18] sm:$0xff] %v1062_v26  ;;  %v1197_v49 = vld [vmem:[#allocation2] sm:$0xff] (%p135_p9) }
 0x1fe   : > { %1068 = vst [vmem:[#allocation2 + $0x20] sm:$0xff] %v1063_v59  ;;  %1385 = vmatmul.mubr.f32.gmra.mrb[4].mxu1 %v1061_v58  ;;  %1202 = vst [vmem:[#allocation18] sm:$0xff] (%p135_p9), %v1197_v49 }
 0x1ff   : > { %1387 = vmatprep.mubr.msk.f32.mxu1 %vm1692_vm0, %v2740_v60 }
 0x200   :  { %v1198_v42 = vld [vmem:[#allocation2 + $0x8] sm:$0xff] (%p135_p9) }
 0x201   :  { %1203 = vst [vmem:[#allocation18 + $0x8] sm:$0xff] (%p135_p9), %v1198_v42 }
 0x202   : > { %1388 = vmatmul.mubr.f32.gmra.mrb[6].mxu1 %v1062_v26  ;;  %v1199_v21 = vld [vmem:[#allocation2 + $0x10] sm:$0xff] (%p135_p9) }
 0x203   : > { %1390 = vmatprep.mubr.msk.f32.mxu1 %vm1692_vm0, %v2740_v60  ;;  %1204 = vst [vmem:[#allocation18 + $0x10] sm:$0xff] (%p135_p9), %v1199_v21 }
 0x204   :  { %v1200_v57 = vld [vmem:[#allocation2 + $0x18] sm:$0xff] (%p135_p9) }
 0x205   :  { %v1201_v58 = vld [vmem:[#allocation2 + $0x20] sm:$0xff] (%p135_p9)  ;;  %1205 = vst [vmem:[#allocation18 + $0x18] sm:$0xff] (%p135_p9), %v1200_v57 }
 0x206   : > { %1391 = vmatmul.mubr.f32.gmra.mrb[8].mxu1 %v1063_v59  ;;  %1206 = vst [vmem:[#allocation18 + $0x20] sm:$0xff] (%p135_p9), %v1201_v58 }
 0x211   : > { %v625_v17 = vpop.f32.mrb[0].mxu0 }
 0x212   : > { %v1333_v16 = vpop.f32.mrb[1].mxu0  ;;  %v654_v2 = vmul.f32 %v649_v46, %v625_v17 }
 0x216   : > { %v630_v34 = vpop.f32.mrb[2].mxu0 }
 0x217   : > { %v655_v11 = vmul.f32 %v650_v62, %v630_v34  ;;  %v1336_v14 = vpop.f32.mrb[3].mxu0 }
 0x219   : > { %v659_v25 = vadd.f32 %v655_v11, %v654_v2 }
 0x21a   : > { %v635_v0 = vpop.f32.mrb[4].mxu0 }
 0x21b   : > { %v656_v29 = vmul.f32 %v651_v35, %v635_v0  ;;  %v1339_v23 = vpop.f32.mrb[5].mxu0 }
 0x21d   : > { %v660_v40 = vadd.f32 %v659_v25, %v656_v29 }
 0x21e   : > { %v640_v52 = vpop.f32.mrb[6].mxu0 }
 0x21f   : > { %v657_v48 = vmul.f32 %v652_v50, %v640_v52  ;;  %v1342_v5 = vpop.f32.mrb[7].mxu0 }
 0x221   : > { %v661_v38 = vadd.f32 %v660_v40, %v657_v48 }
 0x222   : > { %v645_v19 = vpop.f32.mrb[8].mxu0 }
 0x223   : > { %v658_v3 = vmul.f32 %v653_v63, %v645_v19  ;;  %v1345_v8 = vpop.f32.mrb[9].mxu0 }
 0x225   : > { %v662_v28 = vadd.f32 %v661_v38, %v658_v3 }
 0x227   : > { %v663_v30 = vrot.slane %v662_v28, 4 }
 0x229   : > { %v664_v36 = vadd.f32 %v663_v30, %v662_v28 }
 0x22b   : > { %v665_v6 = vrot.slane %v664_v36, 2 }
 0x22d   : > { %v666_v20 = vadd.f32 %v665_v6, %v664_v36 }
 0x22f   : > { %v667_v55 = vrot.slane %v666_v20, 1 }
 0x231   : > { %v668_v31 = vadd.f32 %v667_v55, %v666_v20 }
 0x233   : > { %670 = vst [vmem:[%s669_s26] sm:$0x1] %v668_v31 }
 0x2c9   : > { %v1151_v22 = vpop.f32.mrb[0].mxu1 }
 0x2ca   : > { %v1380_v53 = vpop.f32.mrb[1].mxu1  ;;  %v1180_v24 = vmul.f32 %v1151_v22, %v649_v46 }
 0x2cd   : > { %v1156_v32 = vpop.f32.mrb[2].mxu1 }
 0x2ce   : > { %v1181_v61 = vmul.f32 %v1156_v32, %v650_v62  ;;  %v1383_v56 = vpop.f32.mrb[3].mxu1 }
 0x2d0   : > { %v1185_v1 = vadd.f32 %v1181_v61, %v1180_v24 }
 0x2d1   : > { %v1161_v51 = vpop.f32.mrb[4].mxu1 }
 0x2d2   : > { %v1182_v10 = vmul.f32 %v1161_v51, %v651_v35  ;;  %v1386_v18 = vpop.f32.mrb[5].mxu1 }
 0x2d4   : > { %v1186_v43 = vadd.f32 %v1185_v1, %v1182_v10 }
 0x2d5   : > { %v1166_v9 = vpop.f32.mrb[6].mxu1 }
 0x2d6   : > { %v1183_v44 = vmul.f32 %v1166_v9, %v652_v50  ;;  %v1389_v4 = vpop.f32.mrb[7].mxu1 }
 0x2d8   : > { %v1187_v47 = vadd.f32 %v1186_v43, %v1183_v44 }
 0x2d9   : > { %v1171_v45 = vpop.f32.mrb[8].mxu1 }
 0x2da   : > { %v1184_v27 = vmul.f32 %v1171_v45, %v653_v63  ;;  %v1392_v37 = vpop.f32.mrb[9].mxu1 }
 0x2dc   : > { %v1188_v39 = vadd.f32 %v1187_v47, %v1184_v27 }
 0x2de   : > { %v1189_v33 = vrot.slane %v1188_v39, 4 }
 0x2e0   : > { %v1190_v15 = vadd.f32 %v1189_v33, %v1188_v39 }
 0x2e2   : > { %v1191_v12 = vrot.slane %v1190_v15, 2 }
 0x2e4   : > { %v1192_v54 = vadd.f32 %v1191_v12, %v1190_v15  ;;  %137 = sbr.rel (!%p135_p9) target bundleno = 127 (0x7f), region = 93 }
 0x2e6   : > { %v1193_v7 = vrot.slane %v1192_v54, 1 }
 0x2e8   : > { %v1194_v60 = vadd.f32 %v1193_v7, %v1192_v54 }
 0x2ea   : > { %1256 = vst [vmem:[%s669_s26 + $0x1] sm:$0x1] %v1194_v60 }
 0x2eb   :  { %1622 = shalt.err (!%p1619_p0)
}
 0x2ec   :  { %s1623_s9 = scalar_lea.hbm %s2635_s7, 256 }
 0x2ed   :  { %p1624_p1 = scmp.ne.s32.totalorder %s2635_s7, %s1623_s9  ;;  %p1627_p2 = scmp.lt.u32.totalorder %s1623_s9, %s2635_s7 }
 0x2ef   :  { %p1629_p3 = pnand %p1627_p2, %p1624_p1 }
 0x2f1   :  { %1632 = shalt.err (!%p1629_p3)
}
 0x2f2   :  { %1218 = dma.vmem_to_hbm [thread:$0]  %s1213_s29, 256, %s2635_s7, [#allocation6], %s1679_s17, %s1679_s17, %s1680_s18  }
 0x2f3   :  { %s1633_s16 = scalar_lea.vmem %s2591_s0, 640  ;;  %p1638_p5 = scmp.lt.s32.totalorder %s2591_s0, %s2591_s0 }
 0x2f4   :  { %p1634_p4 = scmp.ne.s32.totalorder %s2591_s0, %s1633_s16  ;;  %p1639_p6 = scmp.lt.s32.totalorder %s1633_s16, %s1633_s16 }
 0x2f6   :  { %p1640_p7 = por %p1639_p6, %p1638_p5 }
 0x2f8   :  { %p1641_p8 = pnand %p1640_p7, %p1634_p4 }
 0x2fa   :  { %1644 = shalt.err (!%p1641_p8)
}
 0x2fb   :  { %s1645_s6 = scalar_lea.hbm %s2636_s8, 640 }
 0x2fc   :  { %p1646_p9 = scmp.ne.s32.totalorder %s2636_s8, %s1645_s6  ;;  %p1649_p10 = scmp.lt.u32.totalorder %s1645_s6, %s2636_s8 }
 0x2fe   :  { %p1651_p11 = pnand %p1649_p10, %p1646_p9 }
 0x300   :  { %1654 = shalt.err (!%p1651_p11)
}
 0x301   :  { %1230 = dma.vmem_to_hbm [thread:$0]  %s2591_s0, 640, %s2636_s8, [#allocation19], %s1679_s17, %s1679_s17, %s1680_s18  }
 0x302   :  { %1669 = dma.done.wait [#allocation6], 256  }
 0x303   :  { %1670 = vsyncadd [#allocation6], 4294967040 }
 0x304   :  { %1671 = dma.done.wait [#allocation19], 640  }
 0x305   :  { %1672 = vsyncadd [#allocation19], 4294966656 }
 0x306   :  { %1237 = vsyncpa [#allocation5], 1 }
 0x307   :  { %1238 = vsyncpa [#allocation10], 1 }
 0x308   :  { %1239 = vsyncpa [#allocation13], 1 }
 0x309   :  { %1240 = vsyncpa [#allocation16], 1 }
 0x30a   :  { %1241 = vsyncpa [#allocation6], 1 }
 0x30b   :  { %1242 = vsyncpa [#allocation19], 1 }
 0x30c   :  { %1243 = vsyncpa [#allocation7], 1 }

</bundles_post_ra>
